<compile_context>
chip_gen: v5e
topology: v5e:2x2
jax: 0.10.0
libtpu: 0.0.40
codegen_flags: <defaults>
</compile_context>

<pallas_src>
import functools

import jax
import jax.numpy as jnp
from jax.experimental import pallas as pl
from jax.experimental.pallas import tpu as pltpu


def _round_up(x, m):
    return (x + m - 1) // m * m


def _rnn_seq_kernel(x_ref, h0_ref, w1_ref, w2_ref, b_ref,
                    out_ref, hfin_ref,
                    *, seq_len, batch_pad, hidden_pad):
    # ---- Phase 1 (non-recurrent): one big MXU-row-filling matmul ------------
    # U[t*Bp + b, :] = x_t[b] @ [W_i2h | W_i2o] + [b_i2h | b_i2o | -1e30 mask]
    u = (jnp.dot(x_ref[...], w1_ref[...], preferred_element_type=jnp.float32)
         + b_ref[...])                                       # (T*Bp, n_pad) f32

    # ---- Phase 2 (serial recurrence): z_t = U_t + h_{t-1} @ W2 --------------
    h = h0_ref[...]                                          # (Bp, Hp) f32 carry
    for t in range(seq_len):                                 # tiny static T -> fully unrolled
        r0 = t * batch_pad                                   # static, (8,128)-aligned row slice
        z = u[r0:r0 + batch_pad, :] + jnp.dot(
            h.astype(w2_ref.dtype), w2_ref[...],
            preferred_element_type=jnp.float32)              # (Bp, n_pad) f32

        h = z[:, :hidden_pad]                                # new hidden (lane-aligned slice)
        logits = z[:, hidden_pad:]                           # padded lanes already ~-inf via bias

        # Numerically stable log-softmax over valid output lanes.
        m = jnp.max(logits, axis=-1, keepdims=True)
        shifted = logits - m
        lse = jnp.log(jnp.sum(jnp.exp(shifted), axis=-1, keepdims=True))
        out_ref[r0:r0 + batch_pad, :] = (shifted - lse).astype(out_ref.dtype)

    hfin_ref[...] = h                                        # written once, at the end


def init_params(key, input_size, hidden_size, output_size):
    """nn.Linear-style uniform(-1/sqrt(fan_in), +1/sqrt(fan_in)) init (f32)."""
    fan_in = input_size + hidden_size
    bound = 1.0 / float(fan_in) ** 0.5
    k = jax.random.split(key, 4)
    w_i2h = jax.random.uniform(k[0], (fan_in, hidden_size), jnp.float32, -bound, bound)
    b_i2h = jax.random.uniform(k[1], (1, hidden_size), jnp.float32, -bound, bound)
    w_i2o = jax.random.uniform(k[2], (fan_in, output_size), jnp.float32, -bound, bound)
    b_i2o = jax.random.uniform(k[3], (1, output_size), jnp.float32, -bound, bound)
    return w_i2h, b_i2h, w_i2o, b_i2o


def pack_params(params, input_size, hidden_size, output_size,
                hidden_pad=128, output_pad=128, compute_dtype=jnp.bfloat16,
                mask_value=-1e30):
    """Stack [i2h | i2o] weights along the output axis, pad to 128-lane blocks,
    and bake the padded-logit-lane mask into the bias (zero per-step cost)."""
    w_i2h, b_i2h, w_i2o, b_i2o = params
    n_pad = hidden_pad + output_pad
    w1 = jnp.zeros((input_size, n_pad), jnp.float32)
    w1 = w1.at[:, :hidden_size].set(w_i2h[:input_size])
    w1 = w1.at[:, hidden_pad:hidden_pad + output_size].set(w_i2o[:input_size])
    w2 = jnp.zeros((hidden_pad, n_pad), jnp.float32)
    w2 = w2.at[:hidden_size, :hidden_size].set(w_i2h[input_size:])
    w2 = w2.at[:hidden_size, hidden_pad:hidden_pad + output_size].set(w_i2o[input_size:])
    b = jnp.zeros((1, n_pad), jnp.float32)
    b = b.at[:, :hidden_size].set(b_i2h)
    b = b.at[:, hidden_pad:hidden_pad + output_size].set(b_i2o)
    b = b.at[:, hidden_pad + output_size:].set(mask_value)   # logit-lane mask baked in
    return w1.astype(compute_dtype), w2.astype(compute_dtype), b   # bias stays f32


def rnn_sequence(xs, h0, packed, *, hidden_size, output_size,
                 hidden_pad=128, output_pad=128):
    """Run the RNN cell over a whole sequence in ONE grid-less pallas_call.

    xs: (T, B, I) f32, h0: (B, H) f32.
    Returns (log_probs: (T, B, O) f32, h_final: (B, H) f32).

    Note: padded batch rows / lanes of the internal buffers are NOT meaningful
    (padded-batch hidden rows accumulate the bias over time, padded logit lanes
    hold ~-1e30); they are sliced off before returning.
    """
    w1, w2, b = packed
    T, B, I = xs.shape
    Bp = _round_up(max(B, 8), 8)
    n_pad = hidden_pad + output_pad

    # Flatten time x batch outside the kernel: one big matmul for the hoisted
    # input projection and static, tile-aligned row slices inside the recurrence.
    xs_p = jnp.zeros((T, Bp, I), w1.dtype).at[:, :B, :].set(xs.astype(w1.dtype))
    xs_flat = xs_p.reshape(T * Bp, I)
    h0_p = jnp.zeros((Bp, hidden_pad), jnp.float32).at[:B, :hidden_size].set(h0)

    kernel = functools.partial(_rnn_seq_kernel,
                               seq_len=T, batch_pad=Bp, hidden_pad=hidden_pad)

    vmem = pl.BlockSpec(memory_space=pltpu.MemorySpace.VMEM)   # whole array, VMEM-resident
    out_flat, h_fin_p = pl.pallas_call(
        kernel,
        out_shape=(jax.ShapeDtypeStruct((T * Bp, output_pad), jnp.float32),
                   jax.ShapeDtypeStruct((Bp, hidden_pad), jnp.float32)),
        in_specs=[vmem, vmem, vmem, vmem, vmem],   # xs_flat, h0, W1, W2, bias
        out_specs=(vmem, vmem),                    # per-step log-probs, final hidden
    )(xs_flat, h0_p, w1, w2, b)

    out = out_flat.reshape(T, Bp, output_pad)
    return out[:, :B, :output_size], h_fin_p[:B, :hidden_size]


def rnn_forward(x, h, packed, *, hidden_size, output_size):
    """Single-step forward matching the PyTorch module: (log_softmax_output, new_hidden)."""
    out, h_new = rnn_sequence(x[None], h, packed,
                              hidden_size=hidden_size, output_size=output_size)
    return out[0], h_new


if __name__ == "__main__":
    input_size, hidden_size, output_size = 16, 32, 8
    batch, seq_len = 2, 8

    key = jax.random.PRNGKey(0)
    kx, kp = jax.random.split(key)

    xs = jax.random.normal(kx, (seq_len, batch, input_size), jnp.float32)
    h0 = jnp.zeros((batch, hidden_size), jnp.float32)   # initHidden, broadcast over batch

    params = init_params(kp, input_size, hidden_size, output_size)
    packed = pack_params(params, input_size, hidden_size, output_size)

    outs, h_final = rnn_sequence(xs, h0, packed,
                                 hidden_size=hidden_size, output_size=output_size)
    jax.block_until_ready((outs, h_final))

    # ---- reference A: per-step plain-JAX with matched numerics (bf16 matmuls, f32 accum) ----
    w_i2h, b_i2h, w_i2o, b_i2o = params
    w_i2h_bf, w_i2o_bf = w_i2h.astype(jnp.bfloat16), w_i2o.astype(jnp.bfloat16)

    def ref_step(x, h):
        comb = jnp.concatenate([x, h], axis=1).astype(jnp.bfloat16)
        new_h = jnp.dot(comb, w_i2h_bf, preferred_element_type=jnp.float32) + b_i2h
        logits = jnp.dot(comb, w_i2o_bf, preferred_element_type=jnp.float32) + b_i2o
        return jax.nn.log_softmax(logits, axis=1), new_h

    h_ref = h0
    for t in range(seq_len):
        out_ref_t, h_ref = ref_step(xs[t], h_ref)
        assert jnp.allclose(outs[t], out_ref_t, atol=2e-3), f"output mismatch at step {t}"
    assert jnp.allclose(h_final, h_ref, atol=2e-3), "final hidden mismatch"

    # single-step API (the module's forward()) also checked
    out1, h1 = rnn_forward(xs[0], h0, packed,
                           hidden_size=hidden_size, output_size=output_size)
    o1_ref, h1_ref = ref_step(xs[0], h0)
    assert jnp.allclose(out1, o1_ref, atol=2e-3), "single-step output mismatch"
    assert jnp.allclose(h1, h1_ref, atol=2e-3), "single-step hidden mismatch"

    # ---- reference B: full-f32 math of the original module (loose tolerance for bf16) ----
    def ref_step_f32(x, h):
        comb = jnp.concatenate([x, h], axis=1)
        return (jax.nn.log_softmax(comb @ w_i2o + b_i2o, axis=1), comb @ w_i2h + b_i2h)

    h_f32 = h0
    for t in range(seq_len):
        out_f32_t, h_f32 = ref_step_f32(xs[t], h_f32)
    assert jnp.allclose(outs[-1], out_f32_t, atol=5e-2), "semantic drift vs f32 reference"

    print("KERNEL_OK")
</pallas_src>

<mosaic_0001>
module attributes {stable_mosaic.version = 11 : i64} {
  func.func @_rnn_seq_kernel(%arg0: memref<64x16xbf16, #tpu.memory_space<vmem>>, %arg1: memref<8x128xf32, #tpu.memory_space<vmem>>, %arg2: memref<16x256xbf16, #tpu.memory_space<vmem>>, %arg3: memref<128x256xbf16, #tpu.memory_space<vmem>>, %arg4: memref<1x256xf32, #tpu.memory_space<vmem>>, %arg5: memref<64x128xf32, #tpu.memory_space<vmem>>, %arg6: memref<8x128xf32, #tpu.memory_space<vmem>>) attributes {dimension_semantics = [], scalar_prefetch = 0 : i64, scratch_operands = 0 : i64, tpu.core_type = #tpu.core_type<tc>} {
    %c0 = arith.constant 0 : index
    %c0_0 = arith.constant 0 : index
    %0 = vector.load %arg0[%c0, %c0_0] : memref<64x16xbf16, #tpu.memory_space<vmem>>, vector<64x16xbf16>
    %c0_1 = arith.constant 0 : index
    %c0_2 = arith.constant 0 : index
    %1 = vector.load %arg2[%c0_1, %c0_2] : memref<16x256xbf16, #tpu.memory_space<vmem>>, vector<16x256xbf16>
    %cst = arith.constant dense<0.000000e+00> : vector<64x256xf32>
    %2 = tpu.matmul %0, %1, %cst {dimension_numbers = #tpu.dot_dimension_numbers<[1], [0], [0], [1], [0, 0, 1, 1], [], []>} : vector<64x16xbf16>, vector<16x256xbf16>, vector<64x256xf32> -> vector<64x256xf32>
    %c0_3 = arith.constant 0 : index
    %c0_4 = arith.constant 0 : index
    %3 = vector.load %arg4[%c0_3, %c0_4] : memref<1x256xf32, #tpu.memory_space<vmem>>, vector<1x256xf32>
    %4 = vector.broadcast %3 : vector<1x256xf32> to vector<64x256xf32>
    %5 = arith.addf %2, %4 : vector<64x256xf32>
    %c0_5 = arith.constant 0 : index
    %c0_6 = arith.constant 0 : index
    %6 = vector.load %arg1[%c0_5, %c0_6] : memref<8x128xf32, #tpu.memory_space<vmem>>, vector<8x128xf32>
    %7 = vector.extract_strided_slice %5 {offsets = [0, 0], sizes = [8, 256], strides = [1, 1]} : vector<64x256xf32> to vector<8x256xf32>
    %8 = arith.truncf %6 : vector<8x128xf32> to vector<8x128xbf16>
    %c0_7 = arith.constant 0 : index
    %c0_8 = arith.constant 0 : index
    %9 = vector.load %arg3[%c0_7, %c0_8] : memref<128x256xbf16, #tpu.memory_space<vmem>>, vector<128x256xbf16>
    %cst_9 = arith.constant dense<0.000000e+00> : vector<8x256xf32>
    %10 = tpu.matmul %8, %9, %cst_9 {dimension_numbers = #tpu.dot_dimension_numbers<[1], [0], [0], [1], [0, 0, 1, 1], [], []>} : vector<8x128xbf16>, vector<128x256xbf16>, vector<8x256xf32> -> vector<8x256xf32>
    %11 = arith.addf %7, %10 : vector<8x256xf32>
    %12 = vector.extract_strided_slice %11 {offsets = [0, 0], sizes = [8, 128], strides = [1, 1]} : vector<8x256xf32> to vector<8x128xf32>
    %13 = vector.extract_strided_slice %11 {offsets = [0, 128], sizes = [8, 128], strides = [1, 1]} : vector<8x256xf32> to vector<8x128xf32>
    %cst_10 = arith.constant dense<0xFF800000> : vector<8xf32>
    %14 = vector.multi_reduction <maximumf>, %13, %cst_10 [1] : vector<8x128xf32> to vector<8xf32>
    %15 = vector.shape_cast %14 : vector<8xf32> to vector<8x1xf32>
    %16 = vector.broadcast %15 : vector<8x1xf32> to vector<8x128xf32>
    %17 = arith.subf %13, %16 : vector<8x128xf32>
    %18 = math.exp %17 : vector<8x128xf32>
    %cst_11 = arith.constant dense<0.000000e+00> : vector<8xf32>
    %19 = vector.multi_reduction <add>, %18, %cst_11 [1] : vector<8x128xf32> to vector<8xf32>
    %20 = vector.shape_cast %19 : vector<8xf32> to vector<8x1xf32>
    %21 = math.log %20 : vector<8x1xf32>
    %22 = vector.broadcast %21 : vector<8x1xf32> to vector<8x128xf32>
    %23 = arith.subf %17, %22 : vector<8x128xf32>
    %c0_12 = arith.constant 0 : index
    %c0_13 = arith.constant 0 : index
    %24 = vector.load %arg5[%c0_12, %c0_13] : memref<64x128xf32, #tpu.memory_space<vmem>>, vector<8x128xf32>
    tpu.vector_store %arg5[%c0_12, %c0_13], %23 {strides = array<i32>} : memref<64x128xf32, #tpu.memory_space<vmem>>, vector<8x128xf32>,
    %25 = vector.extract_strided_slice %5 {offsets = [8, 0], sizes = [8, 256], strides = [1, 1]} : vector<64x256xf32> to vector<8x256xf32>
    %26 = arith.truncf %12 : vector<8x128xf32> to vector<8x128xbf16>
    %c0_14 = arith.constant 0 : index
    %c0_15 = arith.constant 0 : index
    %27 = vector.load %arg3[%c0_14, %c0_15] : memref<128x256xbf16, #tpu.memory_space<vmem>>, vector<128x256xbf16>
    %cst_16 = arith.constant dense<0.000000e+00> : vector<8x256xf32>
    %28 = tpu.matmul %26, %27, %cst_16 {dimension_numbers = #tpu.dot_dimension_numbers<[1], [0], [0], [1], [0, 0, 1, 1], [], []>} : vector<8x128xbf16>, vector<128x256xbf16>, vector<8x256xf32> -> vector<8x256xf32>
    %29 = arith.addf %25, %28 : vector<8x256xf32>
    %30 = vector.extract_strided_slice %29 {offsets = [0, 0], sizes = [8, 128], strides = [1, 1]} : vector<8x256xf32> to vector<8x128xf32>
    %31 = vector.extract_strided_slice %29 {offsets = [0, 128], sizes = [8, 128], strides = [1, 1]} : vector<8x256xf32> to vector<8x128xf32>
    %cst_17 = arith.constant dense<0xFF800000> : vector<8xf32>
    %32 = vector.multi_reduction <maximumf>, %31, %cst_17 [1] : vector<8x128xf32> to vector<8xf32>
    %33 = vector.shape_cast %32 : vector<8xf32> to vector<8x1xf32>
    %34 = vector.broadcast %33 : vector<8x1xf32> to vector<8x128xf32>
    %35 = arith.subf %31, %34 : vector<8x128xf32>
    %36 = math.exp %35 : vector<8x128xf32>
    %cst_18 = arith.constant dense<0.000000e+00> : vector<8xf32>
    %37 = vector.multi_reduction <add>, %36, %cst_18 [1] : vector<8x128xf32> to vector<8xf32>
    %38 = vector.shape_cast %37 : vector<8xf32> to vector<8x1xf32>
    %39 = math.log %38 : vector<8x1xf32>
    %40 = vector.broadcast %39 : vector<8x1xf32> to vector<8x128xf32>
    %41 = arith.subf %35, %40 : vector<8x128xf32>
    %c8 = arith.constant 8 : index
    %c0_19 = arith.constant 0 : index
    %42 = vector.load %arg5[%c8, %c0_19] : memref<64x128xf32, #tpu.memory_space<vmem>>, vector<8x128xf32>
    tpu.vector_store %arg5[%c8, %c0_19], %41 {strides = array<i32>} : memref<64x128xf32, #tpu.memory_space<vmem>>, vector<8x128xf32>,
    %43 = vector.extract_strided_slice %5 {offsets = [16, 0], sizes = [8, 256], strides = [1, 1]} : vector<64x256xf32> to vector<8x256xf32>
    %44 = arith.truncf %30 : vector<8x128xf32> to vector<8x128xbf16>
    %c0_20 = arith.constant 0 : index
    %c0_21 = arith.constant 0 : index
    %45 = vector.load %arg3[%c0_20, %c0_21] : memref<128x256xbf16, #tpu.memory_space<vmem>>, vector<128x256xbf16>
    %cst_22 = arith.constant dense<0.000000e+00> : vector<8x256xf32>
    %46 = tpu.matmul %44, %45, %cst_22 {dimension_numbers = #tpu.dot_dimension_numbers<[1], [0], [0], [1], [0, 0, 1, 1], [], []>} : vector<8x128xbf16>, vector<128x256xbf16>, vector<8x256xf32> -> vector<8x256xf32>
    %47 = arith.addf %43, %46 : vector<8x256xf32>
    %48 = vector.extract_strided_slice %47 {offsets = [0, 0], sizes = [8, 128], strides = [1, 1]} : vector<8x256xf32> to vector<8x128xf32>
    %49 = vector.extract_strided_slice %47 {offsets = [0, 128], sizes = [8, 128], strides = [1, 1]} : vector<8x256xf32> to vector<8x128xf32>
    %cst_23 = arith.constant dense<0xFF800000> : vector<8xf32>
    %50 = vector.multi_reduction <maximumf>, %49, %cst_23 [1] : vector<8x128xf32> to vector<8xf32>
    %51 = vector.shape_cast %50 : vector<8xf32> to vector<8x1xf32>
    %52 = vector.broadcast %51 : vector<8x1xf32> to vector<8x128xf32>
    %53 = arith.subf %49, %52 : vector<8x128xf32>
    %54 = math.exp %53 : vector<8x128xf32>
    %cst_24 = arith.constant dense<0.000000e+00> : vector<8xf32>
    %55 = vector.multi_reduction <add>, %54, %cst_24 [1] : vector<8x128xf32> to vector<8xf32>
    %56 = vector.shape_cast %55 : vector<8xf32> to vector<8x1xf32>
    %57 = math.log %56 : vector<8x1xf32>
    %58 = vector.broadcast %57 : vector<8x1xf32> to vector<8x128xf32>
    %59 = arith.subf %53, %58 : vector<8x128xf32>
    %c16 = arith.constant 16 : index
    %c0_25 = arith.constant 0 : index
    %60 = vector.load %arg5[%c16, %c0_25] : memref<64x128xf32, #tpu.memory_space<vmem>>, vector<8x128xf32>
    tpu.vector_store %arg5[%c16, %c0_25], %59 {strides = array<i32>} : memref<64x128xf32, #tpu.memory_space<vmem>>, vector<8x128xf32>,
    %61 = vector.extract_strided_slice %5 {offsets = [24, 0], sizes = [8, 256], strides = [1, 1]} : vector<64x256xf32> to vector<8x256xf32>
    %62 = arith.truncf %48 : vector<8x128xf32> to vector<8x128xbf16>
    %c0_26 = arith.constant 0 : index
    %c0_27 = arith.constant 0 : index
    %63 = vector.load %arg3[%c0_26, %c0_27] : memref<128x256xbf16, #tpu.memory_space<vmem>>, vector<128x256xbf16>
    %cst_28 = arith.constant dense<0.000000e+00> : vector<8x256xf32>
    %64 = tpu.matmul %62, %63, %cst_28 {dimension_numbers = #tpu.dot_dimension_numbers<[1], [0], [0], [1], [0, 0, 1, 1], [], []>} : vector<8x128xbf16>, vector<128x256xbf16>, vector<8x256xf32> -> vector<8x256xf32>
    %65 = arith.addf %61, %64 : vector<8x256xf32>
    %66 = vector.extract_strided_slice %65 {offsets = [0, 0], sizes = [8, 128], strides = [1, 1]} : vector<8x256xf32> to vector<8x128xf32>
    %67 = vector.extract_strided_slice %65 {offsets = [0, 128], sizes = [8, 128], strides = [1, 1]} : vector<8x256xf32> to vector<8x128xf32>
    %cst_29 = arith.constant dense<0xFF800000> : vector<8xf32>
    %68 = vector.multi_reduction <maximumf>, %67, %cst_29 [1] : vector<8x128xf32> to vector<8xf32>
    %69 = vector.shape_cast %68 : vector<8xf32> to vector<8x1xf32>
    %70 = vector.broadcast %69 : vector<8x1xf32> to vector<8x128xf32>
    %71 = arith.subf %67, %70 : vector<8x128xf32>
    %72 = math.exp %71 : vector<8x128xf32>
    %cst_30 = arith.constant dense<0.000000e+00> : vector<8xf32>
    %73 = vector.multi_reduction <add>, %72, %cst_30 [1] : vector<8x128xf32> to vector<8xf32>
    %74 = vector.shape_cast %73 : vector<8xf32> to vector<8x1xf32>
    %75 = math.log %74 : vector<8x1xf32>
    %76 = vector.broadcast %75 : vector<8x1xf32> to vector<8x128xf32>
    %77 = arith.subf %71, %76 : vector<8x128xf32>
    %c24 = arith.constant 24 : index
    %c0_31 = arith.constant 0 : index
    %78 = vector.load %arg5[%c24, %c0_31] : memref<64x128xf32, #tpu.memory_space<vmem>>, vector<8x128xf32>
    tpu.vector_store %arg5[%c24, %c0_31], %77 {strides = array<i32>} : memref<64x128xf32, #tpu.memory_space<vmem>>, vector<8x128xf32>,
    %79 = vector.extract_strided_slice %5 {offsets = [32, 0], sizes = [8, 256], strides = [1, 1]} : vector<64x256xf32> to vector<8x256xf32>
    %80 = arith.truncf %66 : vector<8x128xf32> to vector<8x128xbf16>
    %c0_32 = arith.constant 0 : index
    %c0_33 = arith.constant 0 : index
    %81 = vector.load %arg3[%c0_32, %c0_33] : memref<128x256xbf16, #tpu.memory_space<vmem>>, vector<128x256xbf16>
    %cst_34 = arith.constant dense<0.000000e+00> : vector<8x256xf32>
    %82 = tpu.matmul %80, %81, %cst_34 {dimension_numbers = #tpu.dot_dimension_numbers<[1], [0], [0], [1], [0, 0, 1, 1], [], []>} : vector<8x128xbf16>, vector<128x256xbf16>, vector<8x256xf32> -> vector<8x256xf32>
    %83 = arith.addf %79, %82 : vector<8x256xf32>
    %84 = vector.extract_strided_slice %83 {offsets = [0, 0], sizes = [8, 128], strides = [1, 1]} : vector<8x256xf32> to vector<8x128xf32>
    %85 = vector.extract_strided_slice %83 {offsets = [0, 128], sizes = [8, 128], strides = [1, 1]} : vector<8x256xf32> to vector<8x128xf32>
    %cst_35 = arith.constant dense<0xFF800000> : vector<8xf32>
    %86 = vector.multi_reduction <maximumf>, %85, %cst_35 [1] : vector<8x128xf32> to vector<8xf32>
    %87 = vector.shape_cast %86 : vector<8xf32> to vector<8x1xf32>
    %88 = vector.broadcast %87 : vector<8x1xf32> to vector<8x128xf32>
    %89 = arith.subf %85, %88 : vector<8x128xf32>
    %90 = math.exp %89 : vector<8x128xf32>
    %cst_36 = arith.constant dense<0.000000e+00> : vector<8xf32>
    %91 = vector.multi_reduction <add>, %90, %cst_36 [1] : vector<8x128xf32> to vector<8xf32>
    %92 = vector.shape_cast %91 : vector<8xf32> to vector<8x1xf32>
    %93 = math.log %92 : vector<8x1xf32>
    %94 = vector.broadcast %93 : vector<8x1xf32> to vector<8x128xf32>
    %95 = arith.subf %89, %94 : vector<8x128xf32>
    %c32 = arith.constant 32 : index
    %c0_37 = arith.constant 0 : index
    %96 = vector.load %arg5[%c32, %c0_37] : memref<64x128xf32, #tpu.memory_space<vmem>>, vector<8x128xf32>
    tpu.vector_store %arg5[%c32, %c0_37], %95 {strides = array<i32>} : memref<64x128xf32, #tpu.memory_space<vmem>>, vector<8x128xf32>,
    %97 = vector.extract_strided_slice %5 {offsets = [40, 0], sizes = [8, 256], strides = [1, 1]} : vector<64x256xf32> to vector<8x256xf32>
    %98 = arith.truncf %84 : vector<8x128xf32> to vector<8x128xbf16>
    %c0_38 = arith.constant 0 : index
    %c0_39 = arith.constant 0 : index
    %99 = vector.load %arg3[%c0_38, %c0_39] : memref<128x256xbf16, #tpu.memory_space<vmem>>, vector<128x256xbf16>
    %cst_40 = arith.constant dense<0.000000e+00> : vector<8x256xf32>
    %100 = tpu.matmul %98, %99, %cst_40 {dimension_numbers = #tpu.dot_dimension_numbers<[1], [0], [0], [1], [0, 0, 1, 1], [], []>} : vector<8x128xbf16>, vector<128x256xbf16>, vector<8x256xf32> -> vector<8x256xf32>
    %101 = arith.addf %97, %100 : vector<8x256xf32>
    %102 = vector.extract_strided_slice %101 {offsets = [0, 0], sizes = [8, 128], strides = [1, 1]} : vector<8x256xf32> to vector<8x128xf32>
    %103 = vector.extract_strided_slice %101 {offsets = [0, 128], sizes = [8, 128], strides = [1, 1]} : vector<8x256xf32> to vector<8x128xf32>
    %cst_41 = arith.constant dense<0xFF800000> : vector<8xf32>
    %104 = vector.multi_reduction <maximumf>, %103, %cst_41 [1] : vector<8x128xf32> to vector<8xf32>
    %105 = vector.shape_cast %104 : vector<8xf32> to vector<8x1xf32>
    %106 = vector.broadcast %105 : vector<8x1xf32> to vector<8x128xf32>
    %107 = arith.subf %103, %106 : vector<8x128xf32>
    %108 = math.exp %107 : vector<8x128xf32>
    %cst_42 = arith.constant dense<0.000000e+00> : vector<8xf32>
    %109 = vector.multi_reduction <add>, %108, %cst_42 [1] : vector<8x128xf32> to vector<8xf32>
    %110 = vector.shape_cast %109 : vector<8xf32> to vector<8x1xf32>
    %111 = math.log %110 : vector<8x1xf32>
    %112 = vector.broadcast %111 : vector<8x1xf32> to vector<8x128xf32>
    %113 = arith.subf %107, %112 : vector<8x128xf32>
    %c40 = arith.constant 40 : index
    %c0_43 = arith.constant 0 : index
    %114 = vector.load %arg5[%c40, %c0_43] : memref<64x128xf32, #tpu.memory_space<vmem>>, vector<8x128xf32>
    tpu.vector_store %arg5[%c40, %c0_43], %113 {strides = array<i32>} : memref<64x128xf32, #tpu.memory_space<vmem>>, vector<8x128xf32>,
    %115 = vector.extract_strided_slice %5 {offsets = [48, 0], sizes = [8, 256], strides = [1, 1]} : vector<64x256xf32> to vector<8x256xf32>
    %116 = arith.truncf %102 : vector<8x128xf32> to vector<8x128xbf16>
    %c0_44 = arith.constant 0 : index
    %c0_45 = arith.constant 0 : index
    %117 = vector.load %arg3[%c0_44, %c0_45] : memref<128x256xbf16, #tpu.memory_space<vmem>>, vector<128x256xbf16>
    %cst_46 = arith.constant dense<0.000000e+00> : vector<8x256xf32>
    %118 = tpu.matmul %116, %117, %cst_46 {dimension_numbers = #tpu.dot_dimension_numbers<[1], [0], [0], [1], [0, 0, 1, 1], [], []>} : vector<8x128xbf16>, vector<128x256xbf16>, vector<8x256xf32> -> vector<8x256xf32>
    %119 = arith.addf %115, %118 : vector<8x256xf32>
    %120 = vector.extract_strided_slice %119 {offsets = [0, 0], sizes = [8, 128], strides = [1, 1]} : vector<8x256xf32> to vector<8x128xf32>
    %121 = vector.extract_strided_slice %119 {offsets = [0, 128], sizes = [8, 128], strides = [1, 1]} : vector<8x256xf32> to vector<8x128xf32>
    %cst_47 = arith.constant dense<0xFF800000> : vector<8xf32>
    %122 = vector.multi_reduction <maximumf>, %121, %cst_47 [1] : vector<8x128xf32> to vector<8xf32>
    %123 = vector.shape_cast %122 : vector<8xf32> to vector<8x1xf32>
    %124 = vector.broadcast %123 : vector<8x1xf32> to vector<8x128xf32>
    %125 = arith.subf %121, %124 : vector<8x128xf32>
    %126 = math.exp %125 : vector<8x128xf32>
    %cst_48 = arith.constant dense<0.000000e+00> : vector<8xf32>
    %127 = vector.multi_reduction <add>, %126, %cst_48 [1] : vector<8x128xf32> to vector<8xf32>
    %128 = vector.shape_cast %127 : vector<8xf32> to vector<8x1xf32>
    %129 = math.log %128 : vector<8x1xf32>
    %130 = vector.broadcast %129 : vector<8x1xf32> to vector<8x128xf32>
    %131 = arith.subf %125, %130 : vector<8x128xf32>
    %c48 = arith.constant 48 : index
    %c0_49 = arith.constant 0 : index
    %132 = vector.load %arg5[%c48, %c0_49] : memref<64x128xf32, #tpu.memory_space<vmem>>, vector<8x128xf32>
    tpu.vector_store %arg5[%c48, %c0_49], %131 {strides = array<i32>} : memref<64x128xf32, #tpu.memory_space<vmem>>, vector<8x128xf32>,
    %133 = vector.extract_strided_slice %5 {offsets = [56, 0], sizes = [8, 256], strides = [1, 1]} : vector<64x256xf32> to vector<8x256xf32>
    %134 = arith.truncf %120 : vector<8x128xf32> to vector<8x128xbf16>
    %c0_50 = arith.constant 0 : index
    %c0_51 = arith.constant 0 : index
    %135 = vector.load %arg3[%c0_50, %c0_51] : memref<128x256xbf16, #tpu.memory_space<vmem>>, vector<128x256xbf16>
    %cst_52 = arith.constant dense<0.000000e+00> : vector<8x256xf32>
    %136 = tpu.matmul %134, %135, %cst_52 {dimension_numbers = #tpu.dot_dimension_numbers<[1], [0], [0], [1], [0, 0, 1, 1], [], []>} : vector<8x128xbf16>, vector<128x256xbf16>, vector<8x256xf32> -> vector<8x256xf32>
    %137 = arith.addf %133, %136 : vector<8x256xf32>
    %138 = vector.extract_strided_slice %137 {offsets = [0, 0], sizes = [8, 128], strides = [1, 1]} : vector<8x256xf32> to vector<8x128xf32>
    %139 = vector.extract_strided_slice %137 {offsets = [0, 128], sizes = [8, 128], strides = [1, 1]} : vector<8x256xf32> to vector<8x128xf32>
    %cst_53 = arith.constant dense<0xFF800000> : vector<8xf32>
    %140 = vector.multi_reduction <maximumf>, %139, %cst_53 [1] : vector<8x128xf32> to vector<8xf32>
    %141 = vector.shape_cast %140 : vector<8xf32> to vector<8x1xf32>
    %142 = vector.broadcast %141 : vector<8x1xf32> to vector<8x128xf32>
    %143 = arith.subf %139, %142 : vector<8x128xf32>
    %144 = math.exp %143 : vector<8x128xf32>
    %cst_54 = arith.constant dense<0.000000e+00> : vector<8xf32>
    %145 = vector.multi_reduction <add>, %144, %cst_54 [1] : vector<8x128xf32> to vector<8xf32>
    %146 = vector.shape_cast %145 : vector<8xf32> to vector<8x1xf32>
    %147 = math.log %146 : vector<8x1xf32>
    %148 = vector.broadcast %147 : vector<8x1xf32> to vector<8x128xf32>
    %149 = arith.subf %143, %148 : vector<8x128xf32>
    %c56 = arith.constant 56 : index
    %c0_55 = arith.constant 0 : index
    %150 = vector.load %arg5[%c56, %c0_55] : memref<64x128xf32, #tpu.memory_space<vmem>>, vector<8x128xf32>
    tpu.vector_store %arg5[%c56, %c0_55], %149 {strides = array<i32>} : memref<64x128xf32, #tpu.memory_space<vmem>>, vector<8x128xf32>,
    %c0_56 = arith.constant 0 : index
    %c0_57 = arith.constant 0 : index
    %151 = vector.load %arg6[%c0_56, %c0_57] : memref<8x128xf32, #tpu.memory_space<vmem>>, vector<8x128xf32>
    tpu.vector_store %arg6[%c0_56, %c0_57], %138 {strides = array<i32>} : memref<8x128xf32, #tpu.memory_space<vmem>>, vector<8x128xf32>,
    return
  }
}

</mosaic_0001>

<bundles_post_ra>
// kernel: tpu_custom_call.1
= control target key start
LH: loop header
LB: loop body
LE: loop exit
PB: predicated region body
PF: predicated region fallthrough
CT: control target
= control target key end

     0   :  { %12 = vsyncpa [#allocation3], 0  ;;  %s2264_s0 = inlined_call_operand.vmem [shape: bf16[64,16], index: 0, kind: input, shape index: {}]   ;;  %s2265_s1 = inlined_call_operand.vmem [shape: f32[8,128], index: 1, kind: input, shape index: {}]   ;;  %s2266_s2 = inlined_call_operand.vmem [shape: bf16[16,256], index: 2, kind: input, shape index: {}]   ;;  %s2267_s3 = inlined_call_operand.hbm [shape: bf16[128,256], index: 3, kind: input, shape index: {}]   ;;  %s2268_s4 = inlined_call_operand.vmem [shape: f32[1,256], index: 4, kind: input, shape index: {}]   ;;  %s2269_s5 = inlined_call_operand.hbm [shape: f32[64,128], index: 5, kind: output, shape index: {0}]   ;;  %s2270_s6 = inlined_call_operand.hbm [shape: f32[8,128], index: 6, kind: output, shape index: {1}]  }
   0x1   :  { %13 = vsyncpa [#allocation4], 0 }
   0x2   :  { %14 = vsyncpa [#allocation7], 0  ;;  %s25_s23 = sshll.u32 %s2267_s3, 4  ;;  %s2076_s24 = smov [#allocation2]   ;;  %s26_s23 = int_to_ptr.hbm [resolvable:$true] %s25_s23 }
   0x3   :  { %s27_s25 = sshll.u32 %s2076_s24, 4  ;;  %s2077_s26 = smov 128   ;;  %s28_s25 = int_to_ptr.vmem [resolvable:$true] %s27_s25 }
   0x4   :  { %s2078_s27 = smov 8  }
   0x5   :  { %33 = dma.hbm_to_vmem [thread:$0]  %s26_s23, 2048, %s28_s25, [#allocation3], %s2077_s26, %s2077_s26, %s2078_s27  }
   0x6   :  { %2070 = dma.done.wait [#allocation3], 2048  }
   0x7   :  { %2071 = vsyncadd [#allocation3], 4294965248  ;;  %v1373_v0 = vld [vmem:[#allocation2 + $0x70] sm:$0xf]  ;;  %v1848_v1 = vld [vmem:[#allocation2 + $0x74] sm:$0xf0] }
   0x8   :  { %v1365_v2 = vld [vmem:[#allocation2 + $0x60] sm:$0xf]  ;;  %v1374_v3 = vor.u32 %v1848_v1, %v1373_v0  ;;  %v1846_v4 = vld [vmem:[#allocation2 + $0x64] sm:$0xf0]  ;;  %v1357_v6 = vld [vmem:[#allocation2 + $0x50] sm:$0xf] }
   0x9   :  { %v1366_v5 = vor.u32 %v1846_v4, %v1365_v2  ;;  %v1844_v7 = vld [vmem:[#allocation2 + $0x54] sm:$0xf0]  ;;  %v1301_v8 = vld [vmem:[%s2266_s2] sm:$0xf]  ;;  %v1832_v9 = vld [vmem:[%s2266_s2 + $0x4] sm:$0xf0] }
   0xa   :  { %256 = vmatpush.bf16.msra.mxu2 %v1374_v3  ;;  %v1302_v10 = vor.u32 %v1832_v9, %v1301_v8  ;;  %v2131_v11 = vld [vmem:[%s2264_s0] sm:$0xff]  ;;  %vm87_vm0 = vcmask 130048   ;;  %v1847_v12 = vld [vmem:[#allocation2 + $0x74] sm:$0xf]  ;;  %v1358_v13 = vor.u32 %v1844_v7, %v1357_v6  ;;  %v1375_v14 = vld [vmem:[#allocation2 + $0x78] sm:$0xf0] }
   0xb   :  { %v1845_v15 = vld [vmem:[#allocation2 + $0x64] sm:$0xf]  ;;  %v1367_v16 = vld [vmem:[#allocation2 + $0x68] sm:$0xf0]  ;;  %v1349_v17 = vld [vmem:[#allocation2 + $0x40] sm:$0xf]  ;;  %v1378_v19 = vor.u32 %v1847_v12, %v1375_v14 }
   0xc   :  { %107 = vmatpush.bf16.msra.mxu0 %v1302_v10  ;;  %v1842_v18 = vld [vmem:[#allocation2 + $0x44] sm:$0xf0]  ;;  %v1370_v20 = vor.u32 %v1845_v15, %v1367_v16  ;;  %v1843_v22 = vld [vmem:[#allocation2 + $0x54] sm:$0xf]  ;;  %v1359_v23 = vld [vmem:[#allocation2 + $0x58] sm:$0xf0] }
   0xd   :  { %269 = vmatpush.bf16.msra.mxu3 %v1378_v19  ;;  %v1350_v21 = vor.u32 %v1842_v18, %v1349_v17  ;;  %v1341_v24 = vld [vmem:[#allocation2 + $0x30] sm:$0xf]  ;;  %v1840_v25 = vld [vmem:[#allocation2 + $0x34] sm:$0xf0]  ;;  %v1362_v26 = vor.u32 %v1843_v22, %v1359_v23  ;;  %v1841_v28 = vld [vmem:[#allocation2 + $0x44] sm:$0xf] }
   0xe   :  { %257 = vmatpush.bf16.msra.mxu2 %v1366_v5  ;;  %v1342_v27 = vor.u32 %v1840_v25, %v1341_v24  ;;  %v1351_v29 = vld [vmem:[#allocation2 + $0x48] sm:$0xf0]  ;;  %v1333_v30 = vld [vmem:[#allocation2 + $0x20] sm:$0xf]  ;;  %v1838_v31 = vld [vmem:[#allocation2 + $0x24] sm:$0xf0] }
   0xf   :  { %1307 = vmatmul.msk.bf16.vlgmr.msra.gmra.mxu0 %vm87_vm0, %v2131_v11  ;;  %v1354_v32 = vor.u32 %v1841_v28, %v1351_v29  ;;  %v1334_v33 = vor.u32 %v1838_v31, %v1333_v30  ;;  %v1839_v34 = vld [vmem:[#allocation2 + $0x34] sm:$0xf]  ;;  %v1343_v35 = vld [vmem:[#allocation2 + $0x38] sm:$0xf0]  ;;  %v1325_v36 = vld [vmem:[#allocation2 + $0x10] sm:$0xf] }
  0x10   :  { %v1836_v37 = vld [vmem:[#allocation2 + $0x14] sm:$0xf0]  ;;  %v1346_v38 = vor.u32 %v1839_v34, %v1343_v35  ;;  %v1837_v40 = vld [vmem:[#allocation2 + $0x24] sm:$0xf]  ;;  %v1335_v41 = vld [vmem:[#allocation2 + $0x28] sm:$0xf0] }
  0x11   :  { %270 = vmatpush.bf16.msra.mxu3 %v1370_v20  ;;  %v1326_v39 = vor.u32 %v1836_v37, %v1325_v36  ;;  %v1317_v42 = vld [vmem:[#allocation2] sm:$0xf]  ;;  %v1834_v43 = vld [vmem:[#allocation2 + $0x4] sm:$0xf0]  ;;  %v1437_v44 = vld [vmem:[#allocation2 + $0x70] sm:$0xf]  ;;  %v1338_v46 = vor.u32 %v1837_v40, %v1335_v41 }
  0x12   :  { %258 = vmatpush.bf16.msra.mxu2 %v1358_v13  ;;  %v1864_v45 = vld [vmem:[#allocation2 + $0x74] sm:$0xf0]  ;;  %v1318_v47 = vor.u32 %v1834_v43, %v1317_v42  ;;  %v158_v48 = vld [vmem:[%s2265_s1] sm:$0xff]  ;;  %v1835_v49 = vld [vmem:[#allocation2 + $0x14] sm:$0xf]  ;;  %s1268_s23 = sshll.u32 %s2270_s6, 4  ;;  %s1269_s23 = int_to_ptr.hbm [resolvable:$true] %s1268_s23 }
  0x13   :  { %v1327_v50 = vld [vmem:[#allocation2 + $0x18] sm:$0xf0]  ;;  %v1438_v51 = vor.u32 %v1864_v45, %v1437_v44  ;;  %v1429_v52 = vld [vmem:[#allocation2 + $0x60] sm:$0xf]  ;;  %v1862_v53 = vld [vmem:[#allocation2 + $0x64] sm:$0xf0]  ;;  %v159_v54 = vpack.c.bf16 %v158_v48, %v158_v48 }
  0x14   :  { %v1330_v55 = vor.u32 %v1835_v49, %v1327_v50  ;;  %v1833_v56 = vld [vmem:[#allocation2 + $0x4] sm:$0xf]  ;;  %v1319_v57 = vld [vmem:[#allocation2 + $0x8] sm:$0xf0]  ;;  %v1863_v58 = vld [vmem:[#allocation2 + $0x74] sm:$0xf]  ;;  %v1430_v60 = vor.u32 %v1862_v53, %v1429_v52 }
  0x15   :  { %271 = vmatpush.bf16.msra.mxu3 %v1362_v26  ;;  %v1439_v59 = vld [vmem:[#allocation2 + $0x78] sm:$0xf0]  ;;  %v1421_v61 = vld [vmem:[#allocation2 + $0x50] sm:$0xf]  ;;  %v1860_v62 = vld [vmem:[#allocation2 + $0x54] sm:$0xf0]  ;;  %v1322_v63 = vor.u32 %v1833_v56, %v1319_v57 }
  0x16   :  { %259 = vmatpush.bf16.msra.mxu2 %v1350_v21  ;;  %v1442_v0 = vor.u32 %v1863_v58, %v1439_v59  ;;  %v1861_v1 = vld [vmem:[#allocation2 + $0x64] sm:$0xf]  ;;  %v1431_v2 = vld [vmem:[#allocation2 + $0x68] sm:$0xf0]  ;;  %v1422_v3 = vor.u32 %v1860_v62, %v1421_v61  ;;  %v1413_v4 = vld [vmem:[#allocation2 + $0x40] sm:$0xf] }
  0x17   :  { %v1858_v5 = vld [vmem:[#allocation2 + $0x44] sm:$0xf0]  ;;  %v1434_v6 = vor.u32 %v1861_v1, %v1431_v2  ;;  %v1859_v7 = vld [vmem:[#allocation2 + $0x54] sm:$0xf]  ;;  %v1423_v8 = vld [vmem:[#allocation2 + $0x58] sm:$0xf0] }
  0x18   :  { %v1414_v9 = vor.u32 %v1858_v5, %v1413_v4  ;;  %v1426_v10 = vor.u32 %v1859_v7, %v1423_v8  ;;  %v1857_v12 = vld [vmem:[#allocation2 + $0x44] sm:$0xf]  ;;  %v1415_v13 = vld [vmem:[#allocation2 + $0x48] sm:$0xf0]  ;;  %v1405_v15 = vld [vmem:[#allocation2 + $0x30] sm:$0xf] }
  0x19   :  { %272 = vmatpush.bf16.msra.mxu3 %v1354_v32  ;;  %v1418_v14 = vor.u32 %v1857_v12, %v1415_v13  ;;  %v1856_v16 = vld [vmem:[#allocation2 + $0x34] sm:$0xf0]  ;;  %v1855_v17 = vld [vmem:[#allocation2 + $0x34] sm:$0xf]  ;;  %v1407_v19 = vld [vmem:[#allocation2 + $0x38] sm:$0xf0] }
  0x1a   :  { %260 = vmatpush.bf16.msra.mxu2 %v1342_v27  ;;  %v1406_v18 = vor.u32 %v1856_v16, %v1405_v15  ;;  %v1397_v20 = vld [vmem:[#allocation2 + $0x20] sm:$0xf]  ;;  %v1854_v21 = vld [vmem:[#allocation2 + $0x24] sm:$0xf0]  ;;  %v1410_v22 = vor.u32 %v1855_v17, %v1407_v19  ;;  %v1853_v23 = vld [vmem:[#allocation2 + $0x24] sm:$0xf] }
  0x1b   :  { %v1399_v24 = vld [vmem:[#allocation2 + $0x28] sm:$0xf0]  ;;  %v1398_v25 = vor.u32 %v1854_v21, %v1397_v20  ;;  %v1831_v27 = vld [vmem:[%s2266_s2 + $0x4] sm:$0xf]  ;;  %v1389_v29 = vld [vmem:[#allocation2 + $0x10] sm:$0xf] }
  0x1c   :  { %v1402_v26 = vor.u32 %v1853_v23, %v1399_v24  ;;  %v1303_v28 = vld [vmem:[%s2266_s2 + $0x8] sm:$0xf0]  ;;  %v1852_v31 = vld [vmem:[#allocation2 + $0x14] sm:$0xf0]  ;;  %v1851_v32 = vld [vmem:[#allocation2 + $0x14] sm:$0xf] }
  0x1d   :  { %273 = vmatpush.bf16.msra.mxu3 %v1346_v38  ;;  %v1306_v30 = vor.u32 %v1831_v27, %v1303_v28  ;;  %v1390_v34 = vor.u32 %v1852_v31, %v1389_v29  ;;  %v1381_v36 = vld [vmem:[#allocation2] sm:$0xf]  ;;  %v1850_v37 = vld [vmem:[#allocation2 + $0x4] sm:$0xf0]  ;;  %v1849_v38 = vld [vmem:[#allocation2 + $0x4] sm:$0xf] }
  0x1e   :  { %261 = vmatpush.bf16.msra.mxu2 %v1334_v33  ;;  %v1391_v33 = vld [vmem:[#allocation2 + $0x18] sm:$0xf0]  ;;  %v1383_v40 = vld [vmem:[#allocation2 + $0x8] sm:$0xf0]  ;;  %v1501_v42 = vld [vmem:[#allocation2 + $0x70] sm:$0xf] }
  0x1f   :  { %v1394_v35 = vor.u32 %v1851_v32, %v1391_v33  ;;  %136 = vmatpush.bf16.msra.mxu1 %v1306_v30  ;;  %v1386_v41 = vor.u32 %v1849_v38, %v1383_v40  ;;  %v1880_v43 = vld [vmem:[#allocation2 + $0x74] sm:$0xf0]  ;;  %v1828_v44 = vld [vmem:[%s2264_s0 + $0x8] sm:$0xff]  ;;  %v1485_v48 = vld [vmem:[#allocation2 + $0x50] sm:$0xf]  ;;  %s2080_s24 = smov [#allocation5]  }
  0x20   :  { %v1502_v45 = vor.u32 %v1880_v43, %v1501_v42  ;;  %1308 = vmatmul.msk.bf16.gmra.mxu0 %vm87_vm0, %v1828_v44  ;;  %v1876_v49 = vld [vmem:[#allocation2 + $0x54] sm:$0xf0]  ;;  %v1879_v50 = vld [vmem:[#allocation2 + $0x74] sm:$0xf]  ;;  %v1877_v52 = vld [vmem:[#allocation2 + $0x64] sm:$0xf] }
  0x21   :  { %274 = vmatpush.bf16.msra.mxu3 %v1338_v46  ;;  %v1493_v46 = vld [vmem:[#allocation2 + $0x60] sm:$0xf]  ;;  %v1874_v58 = vld [vmem:[#allocation2 + $0x44] sm:$0xf0]  ;;  %v1875_v59 = vld [vmem:[#allocation2 + $0x54] sm:$0xf] }
  0x22   :  { %262 = vmatpush.bf16.msra.mxu2 %v1326_v39  ;;  %1311 = vmatmul.msk.bf16.vlgmr.msra.gmra.mxu1 %vm87_vm0, %v2131_v11  ;;  %v1382_v39 = vor.u32 %v1850_v37, %v1381_v36  ;;  %v1477_v56 = vld [vmem:[#allocation2 + $0x40] sm:$0xf]  ;;  %v1469_v62 = vld [vmem:[#allocation2 + $0x30] sm:$0xf]  ;;  %v1873_v1 = vld [vmem:[#allocation2 + $0x44] sm:$0xf] }
  0x23   :  { %528 = vmatpush.bf16.msrb.mxu0 %v1502_v45  ;;  %v1478_v61 = vor.u32 %v1874_v58, %v1477_v56  ;;  %v1479_v2 = vld [vmem:[#allocation2 + $0x48] sm:$0xf0]  ;;  %v1829_v4 = vld [vmem:[%s2264_s0 + $0x10] sm:$0xff]  ;;  %v1461_v7 = vld [vmem:[#allocation2 + $0x20] sm:$0xf]  ;;  %s1252_s25 = sshll.u32 %s2080_s24, 4  ;;  %s1253_s25 = int_to_ptr.vmem [resolvable:$true] %s1252_s25 }
  0x24   :  { %v1870_v8 = vld [vmem:[#allocation2 + $0x24] sm:$0xf0]  ;;  %v1453_v13 = vld [vmem:[#allocation2 + $0x10] sm:$0xf]  ;;  %v1830_v20 = vld [vmem:[%s2264_s0 + $0x18] sm:$0xff]  ;;  %s2079_s0 = smov [#allocation6]  }
  0x25   :  { %275 = vmatpush.bf16.msra.mxu3 %v1330_v55  ;;  %v1486_v55 = vor.u32 %v1876_v49, %v1485_v48  ;;  %v1871_v24 = vld [vmem:[#allocation2 + $0x34] sm:$0xf]  ;;  %v1463_v28 = vld [vmem:[#allocation2 + $0x28] sm:$0xf0]  ;;  %v1445_v30 = vld [vmem:[#allocation2] sm:$0xf] }
  0x26   :  { %263 = vmatpush.bf16.msra.mxu2 %v1318_v47  ;;  %v1878_v47 = vld [vmem:[#allocation2 + $0x64] sm:$0xf0]  ;;  %v1867_v33 = vld [vmem:[#allocation2 + $0x14] sm:$0xf]  ;;  %v1865_v40 = vld [vmem:[#allocation2 + $0x4] sm:$0xf] }
  0x27   :  { %v1494_v11 = vor.u32 %v1878_v47, %v1493_v46  ;;  %v1866_v31 = vld [vmem:[#allocation2 + $0x4] sm:$0xf0]  ;;  %v1565_v43 = vld [vmem:[#allocation2 + $0x70] sm:$0xf]  ;;  %v1895_v45 = vld [vmem:[#allocation2 + $0x74] sm:$0xf] }
  0x28   :  { %v1446_v32 = vor.u32 %v1866_v31, %v1445_v30  ;;  %v1567_v47 = vld [vmem:[#allocation2 + $0x78] sm:$0xf0]  ;;  %v1557_v48 = vld [vmem:[#allocation2 + $0x60] sm:$0xf]  ;;  %v1894_v49 = vld [vmem:[#allocation2 + $0x64] sm:$0xf0] }
  0x29   :  { %264 = vmatmul.bf16.vlgmr.msra.gmra.mxu2 %v159_v54  ;;  %276 = vmatpush.bf16.msra.mxu3 %v1322_v63  ;;  %v1527_v30 = vld [vmem:[#allocation2 + $0x28] sm:$0xf0]  ;;  %s1266_s20 = sshll.u32 %s2079_s0, 4  ;;  %s1254_s28 = sshll.u32 %s2269_s5, 4  ;;  %s1267_s20 = int_to_ptr.vmem [resolvable:$true] %s1266_s20  ;;  %s1255_s28 = int_to_ptr.hbm [resolvable:$true] %s1254_s28 }
  0x2a   :  { %392 = vmatpush.bf16.msrb.mxu2 %v1438_v51  ;;  %v1503_v51 = vld [vmem:[#allocation2 + $0x78] sm:$0xf0]  ;;  %529 = vmatpush.bf16.msrb.mxu0 %v1494_v11  ;;  %v1570_v11 = vor.u32 %v1895_v45, %v1567_v47  ;;  %v1511_v45 = vld [vmem:[#allocation2 + $0x8] sm:$0xf0] }
  0x2b   :  { %v1506_v53 = vor.u32 %v1879_v50, %v1503_v51  ;;  %v1893_v50 = vld [vmem:[#allocation2 + $0x64] sm:$0xf]  ;;  %v1558_v51 = vor.u32 %v1894_v49, %v1557_v48  ;;  %v1629_v48 = vld [vmem:[#allocation2 + $0x70] sm:$0xf]  ;;  %v1912_v49 = vld [vmem:[#allocation2 + $0x74] sm:$0xf0] }
  0x2c   :  { %277 = vmatmul.bf16.vlgmr.msra.gmra.mxu3 %v159_v54  ;;  %v1495_v54 = vld [vmem:[#allocation2 + $0x68] sm:$0xf0] }
  0x2d   :  { %405 = vmatpush.bf16.msrb.mxu3 %v1442_v0  ;;  %541 = vmatpush.bf16.msrb.mxu1 %v1506_v53  ;;  %v1498_v57 = vor.u32 %v1877_v52, %v1495_v54  ;;  %v1872_v0 = vld [vmem:[#allocation2 + $0x34] sm:$0xf0]  ;;  %v1559_v52 = vld [vmem:[#allocation2 + $0x68] sm:$0xf0] }
  0x2e   :  { %393 = vmatpush.bf16.msrb.mxu2 %v1430_v60  ;;  %v1487_v60 = vld [vmem:[#allocation2 + $0x58] sm:$0xf0]  ;;  %530 = vmatpush.bf16.msrb.mxu0 %v1486_v55  ;;  %v1470_v5 = vor.u32 %v1872_v0, %v1469_v62  ;;  %v1562_v53 = vor.u32 %v1893_v50, %v1559_v52  ;;  %v1911_v50 = vld [vmem:[#allocation2 + $0x74] sm:$0xf] }
  0x2f   :  { %v1490_v63 = vor.u32 %v1875_v59, %v1487_v60  ;;  %v1631_v52 = vld [vmem:[#allocation2 + $0x78] sm:$0xf0] }
  0x30   :  { %1309 = vmatmul.msk.bf16.gmra.mxu0 %vm87_vm0, %v1829_v4 }
  0x31   :  { %406 = vmatpush.bf16.msrb.mxu3 %v1434_v6  ;;  %542 = vmatpush.bf16.msrb.mxu1 %v1498_v57  ;;  %v1482_v6 = vor.u32 %v1873_v1, %v1479_v2  ;;  %v1549_v1 = vld [vmem:[#allocation2 + $0x50] sm:$0xf]  ;;  %v1892_v2 = vld [vmem:[#allocation2 + $0x54] sm:$0xf0] }
  0x32   :  { %394 = vmatpush.bf16.msrb.mxu2 %v1422_v3  ;;  %1312 = vmatmul.msk.bf16.gmra.mxu1 %vm87_vm0, %v1828_v44  ;;  %v51_v3 = vld [vmem:[%s2268_s4] sm:$0x3]  ;;  %v1896_v44 = vld [vmem:[#allocation2 + $0x74] sm:$0xf0] }
  0x33   :  { %531 = vmatpush.bf16.msrb.mxu0 %v1478_v61  ;;  %v2167_v36 = vperm.slane %v51_v3, 1  ;;  %v1566_v46 = vor.u32 %v1896_v44, %v1565_v43  ;;  %v1881_v43 = vld [vmem:[#allocation2 + $0x4] sm:$0xf] }
  0x35   :  { %407 = vmatpush.bf16.msrb.mxu3 %v1426_v10  ;;  %543 = vmatpush.bf16.msrb.mxu1 %v1490_v63  ;;  %v1462_v10 = vor.u32 %v1870_v8, %v1461_v7  ;;  %v1890_v7 = vld [vmem:[#allocation2 + $0x44] sm:$0xf0] }
  0x36   :  { %395 = vmatpush.bf16.msrb.mxu2 %v1414_v9  ;;  %v2157_v9 = vperm.slane %v51_v3, 0  ;;  %v1891_v3 = vld [vmem:[#allocation2 + $0x54] sm:$0xf] }
  0x37   :  { %532 = vmatpush.bf16.msrb.mxu0 %v1470_v5  ;;  %v1551_v5 = vld [vmem:[#allocation2 + $0x58] sm:$0xf0] }
  0x38   :  { %v1554_v8 = vor.u32 %v1891_v3, %v1551_v5 }
  0x39   :  { %408 = vmatpush.bf16.msrb.mxu3 %v1418_v14  ;;  %544 = vmatpush.bf16.msrb.mxu1 %v1482_v6  ;;  %v1868_v14 = vld [vmem:[#allocation2 + $0x14] sm:$0xf0]  ;;  %v1541_v6 = vld [vmem:[#allocation2 + $0x40] sm:$0xf] }
  0x3a   :  { %396 = vmatpush.bf16.msrb.mxu2 %v1406_v18  ;;  %v1454_v16 = vor.u32 %v1868_v14, %v1453_v13  ;;  %v1542_v13 = vor.u32 %v1890_v7, %v1541_v6 }
  0x3b   :  { %533 = vmatpush.bf16.msrb.mxu0 %v1462_v10  ;;  %v1889_v10 = vld [vmem:[#allocation2 + $0x44] sm:$0xf] }
  0x3d   :  { %409 = vmatpush.bf16.msrb.mxu3 %v1410_v22 }
  0x3e   :  { %397 = vmatpush.bf16.msrb.mxu2 %v1398_v25  ;;  %v1471_v25 = vld [vmem:[#allocation2 + $0x38] sm:$0xf0] }
  0x3f   :  { %534 = vmatpush.bf16.msrb.mxu0 %v1454_v16  ;;  %v1474_v27 = vor.u32 %v1871_v24, %v1471_v25  ;;  %v1525_v25 = vld [vmem:[#allocation2 + $0x20] sm:$0xf] }
  0x40   :  { %1310 = vmatmul.msk.bf16.gmra.mxu0 %vm87_vm0, %v1830_v20 }
  0x41   :  { %410 = vmatpush.bf16.msrb.mxu3 %v1402_v26  ;;  %v1869_v26 = vld [vmem:[#allocation2 + $0x24] sm:$0xf]  ;;  %545 = vmatpush.bf16.msrb.mxu1 %v1474_v27 }
  0x42   :  { %398 = vmatpush.bf16.msrb.mxu2 %v1390_v34  ;;  %1313 = vmatmul.msk.bf16.gmra.mxu1 %vm87_vm0, %v1829_v4  ;;  %v1466_v29 = vor.u32 %v1869_v26, %v1463_v28  ;;  %v1455_v34 = vld [vmem:[#allocation2 + $0x18] sm:$0xf0]  ;;  %v1550_v4 = vor.u32 %v1892_v2, %v1549_v1  ;;  %v1886_v26 = vld [vmem:[#allocation2 + $0x24] sm:$0xf0]  ;;  %v1885_v27 = vld [vmem:[#allocation2 + $0x24] sm:$0xf] }
  0x43   :  { %535 = vmatpush.bf16.msrb.mxu0 %v1446_v32  ;;  %v1530_v31 = vor.u32 %v1885_v27, %v1527_v30  ;;  %v1517_v32 = vld [vmem:[#allocation2 + $0x10] sm:$0xf]  ;;  %v1615_v1 = vld [vmem:[#allocation2 + $0x58] sm:$0xf0]  ;;  %v1904_v27 = vld [vmem:[#allocation2 + $0x34] sm:$0xf0] }
  0x45   :  { %411 = vmatpush.bf16.msrb.mxu3 %v1394_v35  ;;  %546 = vmatpush.bf16.msrb.mxu1 %v1466_v29  ;;  %v1458_v35 = vor.u32 %v1867_v33, %v1455_v34  ;;  %v1526_v29 = vor.u32 %v1886_v26, %v1525_v25  ;;  %v1884_v33 = vld [vmem:[#allocation2 + $0x14] sm:$0xf0]  ;;  %v1883_v34 = vld [vmem:[#allocation2 + $0x14] sm:$0xf] }
  0x46   :  { %399 = vmatpush.bf16.msrb.mxu2 %v1382_v39 }
  0x49   :  { %412 = vmatpush.bf16.msrb.mxu3 %v1386_v41  ;;  %547 = vmatpush.bf16.msrb.mxu1 %v1458_v35  ;;  %v1447_v41 = vld [vmem:[#allocation2 + $0x8] sm:$0xf0] }
  0x4a   :  { %v1450_v42 = vor.u32 %v1865_v40, %v1447_v41  ;;  %664 = vmatpush.bf16.msra.mxu2 %v1566_v46  ;;  %v1509_v41 = vld [vmem:[#allocation2] sm:$0xf]  ;;  %v1514_v46 = vor.u32 %v1881_v43, %v1511_v45  ;;  %v1900_v43 = vld [vmem:[#allocation2 + $0x14] sm:$0xf0]  ;;  %v1583_v45 = vld [vmem:[#allocation2 + $0x18] sm:$0xf0] }
  0x4d   :  { %548 = vmatpush.bf16.msrb.mxu1 %v1450_v42  ;;  %677 = vmatpush.bf16.msra.mxu3 %v1570_v11  ;;  %v1882_v42 = vld [vmem:[#allocation2 + $0x4] sm:$0xf0] }
  0x4e   :  { %665 = vmatpush.bf16.msra.mxu2 %v1558_v51  ;;  %v1510_v44 = vor.u32 %v1882_v42, %v1509_v41  ;;  %v1630_v51 = vor.u32 %v1912_v49, %v1629_v48  ;;  %v1581_v42 = vld [vmem:[#allocation2 + $0x10] sm:$0xf]  ;;  %v1573_v49 = vld [vmem:[#allocation2] sm:$0xf] }
  0x50   :  { %800 = vmatpush.bf16.msra.mxu0 %v1630_v51  ;;  %v1897_v51 = vld [vmem:[#allocation2 + $0x4] sm:$0xf] }
  0x51   :  { %678 = vmatpush.bf16.msra.mxu3 %v1562_v53  ;;  %v1621_v53 = vld [vmem:[#allocation2 + $0x60] sm:$0xf] }
  0x52   :  { %1314 = vmatmul.msk.bf16.gmra.mxu1 %vm87_vm0, %v1830_v20  ;;  %666 = vmatpush.bf16.msra.mxu2 %v1550_v4  ;;  %v1888_v20 = vld [vmem:[#allocation2 + $0x34] sm:$0xf0] }
  0x55   :  { %679 = vmatpush.bf16.msra.mxu3 %v1554_v8 }
  0x56   :  { %667 = vmatpush.bf16.msra.mxu2 %v1542_v13 }
  0x8c   :  { %v109_v12 = vpop.f32.mrf.mxu0 }
  0x8d   :  { %v110_v15 = vadd.f32 %v109_v12, %v2157_v9  ;;  %v1543_v12 = vld [vmem:[#allocation2 + $0x48] sm:$0xf0] }
  0x8e   :  { %v1546_v14 = vor.u32 %v1889_v10, %v1543_v12 }
  0x90   :  { %680 = vmatpush.bf16.msra.mxu3 %v1546_v14 }
  0x94   :  { %v111_v55 = vpop.f32.mrf.mxu0 }
  0x95   :  { %v112_v57 = vadd.f32 %v111_v55, %v2157_v9  ;;  %v1634_v55 = vor.u32 %v1911_v50, %v1631_v52  ;;  %v1898_v50 = vld [vmem:[#allocation2 + $0x4] sm:$0xf0] }
  0x96   :  { %v1574_v52 = vor.u32 %v1898_v50, %v1573_v49  ;;  %v1645_v49 = vld [vmem:[#allocation2 + $0x10] sm:$0xf]  ;;  %v1916_v50 = vld [vmem:[#allocation2 + $0x14] sm:$0xf0] }
  0x97   :  { %813 = vmatpush.bf16.msra.mxu1 %v1634_v55  ;;  %v1693_v55 = vld [vmem:[#allocation2 + $0x70] sm:$0xf] }
  0x9d   :  { %v2180_v16 = vpop.f32.mrf.mxu0 }
  0x9e   :  { %v115_v8 = vadd.f32 %v2180_v16, %v2157_v9  ;;  %v1597_v16 = vld [vmem:[#allocation2 + $0x30] sm:$0xf] }
  0x9f   :  { %v138_v37 = vpop.f32.mrf.mxu1  ;;  %v1598_v30 = vor.u32 %v1904_v27, %v1597_v16 }
  0xa0   :  { %v139_v38 = vadd.f32 %v138_v37, %v2167_v36  ;;  %v1518_v37 = vor.u32 %v1884_v33, %v1517_v32  ;;  %v1589_v32 = vld [vmem:[#allocation2 + $0x20] sm:$0xf]  ;;  %v1902_v33 = vld [vmem:[#allocation2 + $0x24] sm:$0xf0] }
  0xa7   :  { %v140_v54 = vpop.f32.mrf.mxu1 }
  0xa8   :  { %v141_v56 = vadd.f32 %v140_v54, %v2167_v36  ;;  %v1910_v54 = vld [vmem:[#allocation2 + $0x64] sm:$0xf0] }
  0xac   :  { %v265_v17 = vpop.f32.mrf.mxu2 }
  0xad   :  { %v282_v18 = vadd.f32 %v265_v17, %v110_v15 }
  0xaf   :  { %v295_v19 = vpack.c.bf16 %v282_v18, %v282_v18  ;;  %v278_v21 = vpop.f32.mrf.mxu3  ;;  %v2178_v15 = vpop.f32.mrf.mxu1 }
  0xb0   :  { %v2170_v39 = vadd.f32 %v278_v21, %v139_v38  ;;  %v2184_v18 = vpop.f32.mrf.mxu0  ;;  %v1887_v21 = vld [vmem:[#allocation2 + $0x34] sm:$0xf]  ;;  %v1519_v38 = vld [vmem:[#allocation2 + $0x18] sm:$0xf0]  ;;  %v144_v7 = vadd.f32 %v2178_v15, %v2167_v36  ;;  %v1607_v15 = vld [vmem:[#allocation2 + $0x48] sm:$0xf0] }
  0xb1   :  { %400 = vmatmul.bf16.vlgmr.msrb.gmra.mxu2 %v295_v19  ;;  %413 = vmatmul.bf16.vlgmr.msrb.gmra.mxu3 %v295_v19  ;;  %v1533_v19 = vld [vmem:[#allocation2 + $0x30] sm:$0xf]  ;;  %v1522_v40 = vor.u32 %v1883_v34, %v1519_v38  ;;  %v1591_v38 = vld [vmem:[#allocation2 + $0x28] sm:$0xf0]  ;;  %v117_v16 = vadd.f32 %v2184_v18, %v2157_v9  ;;  %v1653_v18 = vld [vmem:[#allocation2 + $0x20] sm:$0xf] }
  0xb2   :  { %284 = vmax.xlane.f32.xlu0 %v2170_v39 }
  0xb4   :  { %v267_v22 = vpop.f32.mrf.mxu2 }
  0xb5   :  { %v1534_v22 = vor.u32 %v1888_v20, %v1533_v19 }
  0xb7   :  { %v280_v23 = vpop.f32.mrf.mxu3  ;;  %v2182_v17 = vpop.f32.mrf.mxu1  ;;  %668 = vmatpush.bf16.msra.mxu2 %v1534_v22  ;;  %v1605_v22 = vld [vmem:[#allocation2 + $0x40] sm:$0xf] }
  0xb8   :  { %v1535_v23 = vld [vmem:[#allocation2 + $0x38] sm:$0xf0]  ;;  %v2188_v35 = vpop.f32.mrf.mxu0 }
  0xb9   :  { %v1538_v24 = vor.u32 %v1887_v21, %v1535_v23  ;;  %v1906_v23 = vld [vmem:[#allocation2 + $0x44] sm:$0xf0] }
  0xba   :  { %v1606_v25 = vor.u32 %v1906_v23, %v1605_v22  ;;  %v1922_v22 = vld [vmem:[#allocation2 + $0x44] sm:$0xf0]  ;;  %v1921_v23 = vld [vmem:[#allocation2 + $0x44] sm:$0xf] }
  0xbb   :  { %681 = vmatpush.bf16.msra.mxu3 %v1538_v24  ;;  %669 = vmatpush.bf16.msra.mxu2 %v1526_v29  ;;  %v1905_v24 = vld [vmem:[#allocation2 + $0x44] sm:$0xf]  ;;  %v1903_v29 = vld [vmem:[#allocation2 + $0x34] sm:$0xf] }
  0xbc   :  { %v1610_v26 = vor.u32 %v1905_v24, %v1607_v15  ;;  %v1671_v24 = vld [vmem:[#allocation2 + $0x48] sm:$0xf0] }
  0xbd   :  { %v1674_v15 = vor.u32 %v1921_v23, %v1671_v24  ;;  %v1939_v23 = vld [vmem:[#allocation2 + $0x54] sm:$0xf]  ;;  %v1743_v24 = vld [vmem:[#allocation2 + $0x58] sm:$0xf0] }
  0xbf   :  { %v2186_v28 = vpop.f32.mrf.mxu1  ;;  %682 = vmatpush.bf16.msra.mxu3 %v1530_v31  ;;  %670 = vmatpush.bf16.msra.mxu2 %v1518_v37  ;;  %v1599_v31 = vld [vmem:[#allocation2 + $0x38] sm:$0xf0]  ;;  %v1901_v37 = vld [vmem:[#allocation2 + $0x24] sm:$0xf] }
  0xc0   :  { %v2192_v11 = vpop.f32.mrf.mxu0  ;;  %v1602_v34 = vor.u32 %v1903_v29, %v1599_v31  ;;  %v1594_v41 = vor.u32 %v1901_v37, %v1591_v38  ;;  %v1661_v37 = vld [vmem:[#allocation2 + $0x30] sm:$0xf]  ;;  %v1920_v38 = vld [vmem:[#allocation2 + $0x34] sm:$0xf0] }
  0xc3   :  { %683 = vmatpush.bf16.msra.mxu3 %v1522_v40  ;;  %671 = vmatpush.bf16.msra.mxu2 %v1510_v44  ;;  %v1590_v40 = vor.u32 %v1902_v33, %v1589_v32  ;;  %v1899_v44 = vld [vmem:[#allocation2 + $0x14] sm:$0xf] }
  0xc4   :  { %v1586_v48 = vor.u32 %v1899_v44, %v1583_v45  ;;  %v1917_v44 = vld [vmem:[#allocation2 + $0x24] sm:$0xf] }
  0xc7   :  { %v2190_v47 = vpop.f32.mrf.mxu1  ;;  %684 = vmatpush.bf16.msra.mxu3 %v1514_v46  ;;  %v1582_v46 = vor.u32 %v1900_v43, %v1581_v42  ;;  %v1918_v43 = vld [vmem:[#allocation2 + $0x24] sm:$0xf0] }
  0xc8   :  { %v2196_v2 = vpop.f32.mrf.mxu0  ;;  %v1654_v45 = vor.u32 %v1918_v43, %v1653_v18  ;;  %v1936_v18 = vld [vmem:[#allocation2 + $0x34] sm:$0xf0]  ;;  %v1935_v43 = vld [vmem:[#allocation2 + $0x34] sm:$0xf] }
  0xd0   :  { %v2200_v6 = vpop.f32.mrf.mxu0 }
 0x134   :  { %v401_v58 = vpop.f32.mrf.mxu2  ;;  %v414_v59 = vpop.f32.mrf.mxu3 }
 0x135   :  { %v418_v60 = vadd.f32 %v401_v58, %v112_v57  ;;  %v2175_v61 = vadd.f32 %v414_v59, %v141_v56  ;;  %v1909_v56 = vld [vmem:[#allocation2 + $0x64] sm:$0xf]  ;;  %v1623_v57 = vld [vmem:[#allocation2 + $0x68] sm:$0xf0]  ;;  %v1622_v58 = vor.u32 %v1910_v54, %v1621_v53  ;;  %v2194_v59 = vpop.f32.mrf.mxu1 }
 0x136   :  { %v1575_v53 = vld [vmem:[#allocation2 + $0x8] sm:$0xf0] }
 0x137   :  { %v431_v62 = vpack.c.bf16 %v418_v60, %v418_v60  ;;  %420 = vmax.xlane.f32.xlu0 %v2175_v61  ;;  %v1626_v60 = vor.u32 %v1909_v56, %v1623_v57  ;;  %801 = vmatpush.bf16.msra.mxu0 %v1622_v58  ;;  %v1578_v54 = vor.u32 %v1897_v51, %v1575_v53  ;;  %v1928_v56 = vld [vmem:[#allocation2 + $0x74] sm:$0xf0]  ;;  %v1927_v57 = vld [vmem:[#allocation2 + $0x74] sm:$0xf]  ;;  %v1647_v53 = vld [vmem:[#allocation2 + $0x18] sm:$0xf0] }
 0x138   :  { %v1694_v58 = vor.u32 %v1928_v56, %v1693_v55  ;;  %v1915_v51 = vld [vmem:[#allocation2 + $0x14] sm:$0xf]  ;;  %v1637_v55 = vld [vmem:[#allocation2] sm:$0xf]  ;;  %v1914_v56 = vld [vmem:[#allocation2 + $0x4] sm:$0xf0] }
 0x139   :  { %536 = vmatmul.bf16.vlgmr.msrb.gmra.mxu0 %v431_v62  ;;  %549 = vmatmul.bf16.vlgmr.msrb.gmra.mxu1 %v431_v62  ;;  %v1613_v62 = vld [vmem:[#allocation2 + $0x50] sm:$0xf] }
 0x13a   :  { %814 = vmatpush.bf16.msra.mxu1 %v1626_v60  ;;  %v1695_v60 = vld [vmem:[#allocation2 + $0x78] sm:$0xf0]  ;;  %936 = vmatpush.bf16.msrb.mxu2 %v1694_v58  ;;  %v1638_v58 = vor.u32 %v1914_v56, %v1637_v55  ;;  %v1932_v55 = vld [vmem:[#allocation2 + $0x14] sm:$0xf0]  ;;  %v1931_v56 = vld [vmem:[#allocation2 + $0x14] sm:$0xf] }
 0x13c   :  { %v403_v63 = vpop.f32.mrf.mxu2  ;;  %v416_v0 = vpop.f32.mrf.mxu3 }
 0x13d   :  { %v1908_v63 = vld [vmem:[#allocation2 + $0x54] sm:$0xf0]  ;;  %v1907_v0 = vld [vmem:[#allocation2 + $0x54] sm:$0xf]  ;;  %v2198_v5 = vpop.f32.mrf.mxu1 }
 0x13e   :  { %v1614_v3 = vor.u32 %v1908_v63, %v1613_v62  ;;  %v1618_v4 = vor.u32 %v1907_v0, %v1615_v1  ;;  %v1685_v62 = vld [vmem:[#allocation2 + $0x60] sm:$0xf]  ;;  %v1926_v63 = vld [vmem:[#allocation2 + $0x64] sm:$0xf0]  ;;  %v1698_v0 = vor.u32 %v1927_v57, %v1695_v60  ;;  %v1925_v1 = vld [vmem:[#allocation2 + $0x64] sm:$0xf] }
 0x13f   :  { %v1913_v57 = vld [vmem:[#allocation2 + $0x4] sm:$0xf]  ;;  %v1639_v60 = vld [vmem:[#allocation2 + $0x8] sm:$0xf0] }
 0x140   :  { %802 = vmatpush.bf16.msra.mxu0 %v1614_v3  ;;  %815 = vmatpush.bf16.msra.mxu1 %v1618_v4  ;;  %v1687_v3 = vld [vmem:[#allocation2 + $0x68] sm:$0xf0]  ;;  %v1686_v4 = vor.u32 %v1926_v63, %v1685_v62  ;;  %v1642_v62 = vor.u32 %v1913_v57, %v1639_v60  ;;  %v1757_v63 = vld [vmem:[#allocation2 + $0x70] sm:$0xf]  ;;  %v1711_v57 = vld [vmem:[#allocation2 + $0x18] sm:$0xf0] }
 0x141   :  { %949 = vmatpush.bf16.msrb.mxu3 %v1698_v0  ;;  %v1944_v0 = vld [vmem:[#allocation2 + $0x74] sm:$0xf0]  ;;  %v1714_v60 = vor.u32 %v1931_v56, %v1711_v57  ;;  %v1951_v56 = vld [vmem:[#allocation2 + $0x34] sm:$0xf] }
 0x142   :  { %937 = vmatpush.bf16.msrb.mxu2 %v1686_v4  ;;  %v1759_v4 = vld [vmem:[#allocation2 + $0x78] sm:$0xf0] }
 0x144   :  { %803 = vmatpush.bf16.msra.mxu0 %v1606_v25  ;;  %816 = vmatpush.bf16.msra.mxu1 %v1610_v26  ;;  %v146_v26 = vadd.f32 %v2182_v17, %v2167_v36  ;;  %v1663_v17 = vld [vmem:[#allocation2 + $0x38] sm:$0xf0] }
 0x148   :  { %804 = vmatpush.bf16.msra.mxu0 %v1598_v30  ;;  %817 = vmatpush.bf16.msra.mxu1 %v1602_v34 }
 0x14c   :  { %805 = vmatpush.bf16.msra.mxu0 %v1590_v40  ;;  %818 = vmatpush.bf16.msra.mxu1 %v1594_v41  ;;  %v1919_v40 = vld [vmem:[#allocation2 + $0x34] sm:$0xf]  ;;  %v1662_v41 = vor.u32 %v1920_v38, %v1661_v37  ;;  %v1733_v38 = vld [vmem:[#allocation2 + $0x40] sm:$0xf] }
 0x14d   :  { %v1666_v42 = vor.u32 %v1919_v40, %v1663_v17  ;;  %v1938_v40 = vld [vmem:[#allocation2 + $0x44] sm:$0xf0] }
 0x14e   :  { %v1734_v17 = vor.u32 %v1938_v40, %v1733_v38  ;;  %v1797_v38 = vld [vmem:[#allocation2 + $0x40] sm:$0xf]  ;;  %v1954_v40 = vld [vmem:[#allocation2 + $0x44] sm:$0xf0] }
 0x150   :  { %806 = vmatpush.bf16.msra.mxu0 %v1582_v46  ;;  %819 = vmatpush.bf16.msra.mxu1 %v1586_v48  ;;  %v1655_v46 = vld [vmem:[#allocation2 + $0x28] sm:$0xf0] }
 0x151   :  { %v1658_v48 = vor.u32 %v1917_v44, %v1655_v46  ;;  %v1717_v46 = vld [vmem:[#allocation2 + $0x20] sm:$0xf] }
 0x154   :  { %807 = vmatpush.bf16.msra.mxu0 %v1574_v52  ;;  %820 = vmatpush.bf16.msra.mxu1 %v1578_v54  ;;  %v1646_v52 = vor.u32 %v1916_v50, %v1645_v49  ;;  %v1650_v54 = vor.u32 %v1915_v51, %v1647_v53  ;;  %v1933_v50 = vld [vmem:[#allocation2 + $0x24] sm:$0xf]  ;;  %v1719_v51 = vld [vmem:[#allocation2 + $0x28] sm:$0xf0] }
 0x155   :  { %v1722_v53 = vor.u32 %v1933_v50, %v1719_v51 }
 0x1b6   :  { %v537_v10 = vpop.f32.mrf.mxu0  ;;  %v550_v12 = vpop.f32.mrf.mxu1 }
 0x1b7   :  { %v554_v13 = vadd.f32 %v537_v10, %v115_v8  ;;  %v2206_v14 = vadd.f32 %v550_v12, %v144_v7  ;;  %v1690_v7 = vor.u32 %v1925_v1, %v1687_v3  ;;  %v1677_v8 = vld [vmem:[#allocation2 + $0x50] sm:$0xf]  ;;  %v1924_v10 = vld [vmem:[#allocation2 + $0x54] sm:$0xf0]  ;;  %v1923_v12 = vld [vmem:[#allocation2 + $0x54] sm:$0xf]  ;;  %v1758_v3 = vor.u32 %v1944_v0, %v1757_v63 }
 0x1b8   :  { %v1943_v1 = vld [vmem:[#allocation2 + $0x74] sm:$0xf]  ;;  %v1930_v63 = vld [vmem:[#allocation2 + $0x4] sm:$0xf0]  ;;  %v1929_v0 = vld [vmem:[#allocation2 + $0x4] sm:$0xf] }
 0x1b9   :  { %v567_v19 = vpack.c.bf16 %v554_v13, %v554_v13  ;;  %556 = vmax.xlane.f32.xlu1 %v2206_v14  ;;  %v1679_v13 = vld [vmem:[#allocation2 + $0x58] sm:$0xf0]  ;;  %950 = vmatpush.bf16.msrb.mxu3 %v1690_v7  ;;  %v1749_v7 = vld [vmem:[#allocation2 + $0x60] sm:$0xf] }
 0x1ba   :  { %1072 = vmatpush.bf16.msrb.mxu0 %v1758_v3  ;;  %v1703_v3 = vld [vmem:[#allocation2 + $0x8] sm:$0xf0] }
 0x1bb   :  { %672 = vmatmul.bf16.vlgmr.msra.gmra.mxu2 %v567_v19  ;;  %685 = vmatmul.bf16.vlgmr.msra.gmra.mxu3 %v567_v19  ;;  %v1678_v19 = vor.u32 %v1924_v10, %v1677_v8  ;;  %v1942_v8 = vld [vmem:[#allocation2 + $0x64] sm:$0xf0]  ;;  %v1762_v10 = vor.u32 %v1943_v1, %v1759_v4  ;;  %v1706_v4 = vor.u32 %v1929_v0, %v1703_v3 }
 0x1bd   :  { %938 = vmatpush.bf16.msrb.mxu2 %v1678_v19  ;;  %v1750_v19 = vor.u32 %v1942_v8, %v1749_v7  ;;  %1085 = vmatpush.bf16.msrb.mxu1 %v1762_v10  ;;  %v1821_v7 = vld [vmem:[#allocation2 + $0x70] sm:$0xf]  ;;  %v1960_v8 = vld [vmem:[#allocation2 + $0x74] sm:$0xf0]  ;;  %v1959_v10 = vld [vmem:[#allocation2 + $0x74] sm:$0xf] }
 0x1be   :  { %v539_v20 = vpop.f32.mrf.mxu0  ;;  %v552_v21 = vpop.f32.mrf.mxu1 }
 0x1bf   :  { %v1682_v20 = vor.u32 %v1923_v12, %v1679_v13  ;;  %v1669_v21 = vld [vmem:[#allocation2 + $0x40] sm:$0xf]  ;;  %v1941_v12 = vld [vmem:[#allocation2 + $0x64] sm:$0xf]  ;;  %v1751_v13 = vld [vmem:[#allocation2 + $0x68] sm:$0xf0]  ;;  %1073 = vmatpush.bf16.msrb.mxu0 %v1750_v19 }
 0x1c0   :  { %v1670_v25 = vor.u32 %v1922_v22, %v1669_v21  ;;  %v1741_v21 = vld [vmem:[#allocation2 + $0x50] sm:$0xf]  ;;  %v1940_v22 = vld [vmem:[#allocation2 + $0x54] sm:$0xf0]  ;;  %v1813_v19 = vld [vmem:[#allocation2 + $0x60] sm:$0xf] }
 0x1c1   :  { %951 = vmatpush.bf16.msrb.mxu3 %v1682_v20  ;;  %v1754_v20 = vor.u32 %v1941_v12, %v1751_v13  ;;  %v1822_v12 = vor.u32 %v1960_v8, %v1821_v7  ;;  %v1823_v13 = vld [vmem:[#allocation2 + $0x78] sm:$0xf0]  ;;  %v1948_v7 = vld [vmem:[#allocation2 + $0x14] sm:$0xf0]  ;;  %v1947_v8 = vld [vmem:[#allocation2 + $0x14] sm:$0xf] }
 0x1c2   :  { %939 = vmatpush.bf16.msrb.mxu2 %v1670_v25  ;;  %v1742_v25 = vor.u32 %v1940_v22, %v1741_v21  ;;  %v1826_v21 = vor.u32 %v1959_v10, %v1823_v13  ;;  %v1957_v22 = vld [vmem:[#allocation2 + $0x64] sm:$0xf] }
 0x1c3   :  { %1086 = vmatpush.bf16.msrb.mxu1 %v1754_v20  ;;  %v1958_v20 = vld [vmem:[#allocation2 + $0x64] sm:$0xf0] }
 0x1c4   :  { %1074 = vmatpush.bf16.msrb.mxu0 %v1742_v25 }
 0x1c5   :  { %952 = vmatpush.bf16.msrb.mxu3 %v1674_v15  ;;  %v1746_v15 = vor.u32 %v1939_v23, %v1743_v24  ;;  %v1815_v23 = vld [vmem:[#allocation2 + $0x68] sm:$0xf0]  ;;  %v1814_v24 = vor.u32 %v1958_v20, %v1813_v19  ;;  %v1765_v19 = vld [vmem:[#allocation2] sm:$0xf]  ;;  %v1946_v20 = vld [vmem:[#allocation2 + $0x4] sm:$0xf0] }
 0x1c6   :  { %940 = vmatpush.bf16.msrb.mxu2 %v1662_v41  ;;  %v1937_v41 = vld [vmem:[#allocation2 + $0x44] sm:$0xf]  ;;  %v1818_v25 = vor.u32 %v1957_v22, %v1815_v23  ;;  %v1766_v22 = vor.u32 %v1946_v20, %v1765_v19  ;;  %v1767_v23 = vld [vmem:[#allocation2 + $0x8] sm:$0xf0] }
 0x1c7   :  { %1087 = vmatpush.bf16.msrb.mxu1 %v1746_v15  ;;  %v1805_v15 = vld [vmem:[#allocation2 + $0x50] sm:$0xf] }
 0x1c8   :  { %1075 = vmatpush.bf16.msrb.mxu0 %v1734_v17  ;;  %v1799_v17 = vld [vmem:[#allocation2 + $0x48] sm:$0xf0] }
 0x1c9   :  { %953 = vmatpush.bf16.msrb.mxu3 %v1666_v42 }
 0x1ca   :  { %941 = vmatpush.bf16.msrb.mxu2 %v1654_v45  ;;  %v1727_v45 = vld [vmem:[#allocation2 + $0x38] sm:$0xf0] }
 0x1cb   :  { %v1730_v49 = vor.u32 %v1935_v43, %v1727_v45 }
 0x1cd   :  { %954 = vmatpush.bf16.msrb.mxu3 %v1658_v48  ;;  %v1934_v48 = vld [vmem:[#allocation2 + $0x24] sm:$0xf0] }
 0x1ce   :  { %942 = vmatpush.bf16.msrb.mxu2 %v1646_v52  ;;  %v1718_v52 = vor.u32 %v1934_v48, %v1717_v46 }
 0x1d1   :  { %955 = vmatpush.bf16.msrb.mxu3 %v1650_v54  ;;  %v1709_v54 = vld [vmem:[#allocation2 + $0x10] sm:$0xf] }
 0x1d2   :  { %943 = vmatpush.bf16.msrb.mxu2 %v1638_v58  ;;  %v1710_v58 = vor.u32 %v1932_v55, %v1709_v54  ;;  %v1789_v54 = vld [vmem:[#allocation2 + $0x30] sm:$0xf]  ;;  %v1952_v55 = vld [vmem:[#allocation2 + $0x34] sm:$0xf0] }
 0x1d3   :  { %v1790_v57 = vor.u32 %v1952_v55, %v1789_v54 }
 0x1d5   :  { %956 = vmatpush.bf16.msrb.mxu3 %v1642_v62  ;;  %v1701_v62 = vld [vmem:[#allocation2] sm:$0xf] }
 0x1d6   :  { %v1702_v1 = vor.u32 %v1930_v63, %v1701_v62  ;;  %1208 = vmatpush.bf16.msra.mxu2 %v1822_v12  ;;  %v1950_v62 = vld [vmem:[#allocation2 + $0x24] sm:$0xf0]  ;;  %v1949_v63 = vld [vmem:[#allocation2 + $0x24] sm:$0xf]  ;;  %v1775_v12 = vld [vmem:[#allocation2 + $0x18] sm:$0xf0] }
 0x1d7   :  { %v1778_v13 = vor.u32 %v1947_v8, %v1775_v12 }
 0x1d9   :  { %1221 = vmatpush.bf16.msra.mxu3 %v1826_v21  ;;  %v1945_v21 = vld [vmem:[#allocation2 + $0x4] sm:$0xf] }
 0x1da   :  { %1209 = vmatpush.bf16.msra.mxu2 %v1814_v24  ;;  %v1770_v24 = vor.u32 %v1945_v21, %v1767_v23 }
 0x1dd   :  { %1222 = vmatpush.bf16.msra.mxu3 %v1818_v25 }
 0x23e   :  { %v673_v27 = vpop.f32.mrf.mxu2  ;;  %v686_v29 = vpop.f32.mrf.mxu3 }
 0x23f   :  { %v690_v30 = vadd.f32 %v673_v27, %v117_v16  ;;  %v2213_v31 = vadd.f32 %v686_v29, %v146_v26  ;;  %v149_v26 = vadd.f32 %v2186_v28, %v2167_v36  ;;  %v120_v16 = vadd.f32 %v2188_v35, %v2157_v9  ;;  %v1735_v28 = vld [vmem:[#allocation2 + $0x48] sm:$0xf0]  ;;  %v1725_v35 = vld [vmem:[#allocation2 + $0x30] sm:$0xf] }
 0x240   :  { %v1738_v42 = vor.u32 %v1937_v41, %v1735_v28  ;;  %v1726_v44 = vor.u32 %v1936_v18, %v1725_v35  ;;  %v1953_v41 = vld [vmem:[#allocation2 + $0x44] sm:$0xf]  ;;  %v151_v28 = vadd.f32 %v2190_v47, %v2167_v36  ;;  %v1798_v35 = vor.u32 %v1954_v40, %v1797_v38 }
 0x241   :  { %v703_v32 = vpack.c.bf16 %v690_v30, %v690_v30  ;;  %692 = vmax.xlane.f32.xlu1 %v2213_v31  ;;  %v122_v18 = vadd.f32 %v2192_v11, %v2157_v9 }
 0x242   :  { %1088 = vmatpush.bf16.msrb.mxu1 %v1738_v42  ;;  %1076 = vmatpush.bf16.msrb.mxu0 %v1726_v44 }
 0x243   :  { %808 = vmatmul.bf16.vlgmr.msra.gmra.mxu0 %v703_v32  ;;  %821 = vmatmul.bf16.vlgmr.msra.gmra.mxu1 %v703_v32 }
 0x246   :  { %v675_v33 = vpop.f32.mrf.mxu2  ;;  %v688_v34 = vpop.f32.mrf.mxu3  ;;  %1089 = vmatpush.bf16.msrb.mxu1 %v1730_v49  ;;  %1077 = vmatpush.bf16.msrb.mxu0 %v1718_v52 }
 0x24a   :  { %1090 = vmatpush.bf16.msrb.mxu1 %v1722_v53  ;;  %1078 = vmatpush.bf16.msrb.mxu0 %v1710_v58  ;;  %v1791_v58 = vld [vmem:[#allocation2 + $0x38] sm:$0xf0] }
 0x24e   :  { %1091 = vmatpush.bf16.msrb.mxu1 %v1714_v60  ;;  %1079 = vmatpush.bf16.msrb.mxu0 %v1702_v1  ;;  %v1794_v60 = vor.u32 %v1951_v56, %v1791_v58  ;;  %v1783_v1 = vld [vmem:[#allocation2 + $0x28] sm:$0xf0] }
 0x24f   :  { %v1786_v3 = vor.u32 %v1949_v63, %v1783_v1 }
 0x252   :  { %1092 = vmatpush.bf16.msrb.mxu1 %v1706_v4  ;;  %v1773_v4 = vld [vmem:[#allocation2 + $0x10] sm:$0xf] }
 0x253   :  { %v1774_v10 = vor.u32 %v1948_v7, %v1773_v4 }
 0x2c0   :  { %v809_v27 = vpop.f32.mrf.mxu0  ;;  %v822_v29 = vpop.f32.mrf.mxu1 }
 0x2c1   :  { %v826_v30 = vadd.f32 %v809_v27, %v120_v16  ;;  %v2220_v32 = vadd.f32 %v822_v29, %v149_v26  ;;  %v1956_v26 = vld [vmem:[#allocation2 + $0x54] sm:$0xf0]  ;;  %v1955_v16 = vld [vmem:[#allocation2 + $0x54] sm:$0xf]  ;;  %v1807_v27 = vld [vmem:[#allocation2 + $0x58] sm:$0xf0]  ;;  %v285_v29 = vpop.xlane.xlu0 %284 }
 0x2c3   :  { %v839_v33 = vpack.c.bf16 %v826_v30, %v826_v30  ;;  %828 = vmax.xlane.f32.xlu2 %v2220_v32  ;;  %v2223_v30 = vpop.xlane.xlu1 %556 }
 0x2c5   :  { %944 = vmatmul.bf16.vlgmr.msrb.gmra.mxu2 %v839_v33  ;;  %957 = vmatmul.bf16.vlgmr.msrb.gmra.mxu3 %v839_v33  ;;  %v2226_v33 = vsub.f32 %v2170_v39, %v285_v29  ;;  %v1802_v39 = vor.u32 %v1953_v41, %v1799_v17  ;;  %v154_v29 = vadd.f32 %v2194_v59, %v2167_v36 }
 0x2c7   :  { %v287_v42 = vmul.f32 1.442695, %v2226_v33 }
 0x2c8   :  { %v811_v34 = vpop.f32.mrf.mxu0  ;;  %v824_v37 = vpop.f32.mrf.mxu1 }
 0x2c9   :  { %v1806_v34 = vor.u32 %v1956_v26, %v1805_v15  ;;  %v1810_v37 = vor.u32 %v1955_v16, %v1807_v27  ;;  %1966 = vpow2.f32 %v287_v42  ;;  %v421_v26 = vpop.xlane.xlu0 %420 }
 0x2ca   :  { %v422_v16 = vsub.f32 %v2175_v61, %v421_v26 }
 0x2cb   :  { %1210 = vmatpush.bf16.msra.mxu2 %v1806_v34  ;;  %1223 = vmatpush.bf16.msra.mxu3 %v1810_v37  ;;  %v693_v45 = vpop.xlane.xlu1 %692  ;;  %v125_v34 = vadd.f32 %v2196_v2, %v2157_v9 }
 0x2cc   :  { %v2237_v47 = vsub.f32 %v2213_v31, %v693_v45  ;;  %v1781_v31 = vld [vmem:[#allocation2 + $0x20] sm:$0xf]  ;;  %v423_v37 = vmul.f32 1.442695, %v422_v16 }
 0x2cd   :  { %v1782_v0 = vor.u32 %v1950_v62, %v1781_v31 }
 0x2ce   :  { %v695_v50 = vmul.f32 1.442695, %v2237_v47 }
 0x2cf   :  { %1211 = vmatpush.bf16.msra.mxu2 %v1798_v35  ;;  %1224 = vmatpush.bf16.msra.mxu3 %v1802_v39  ;;  %v1967_v11 = vpop.eup %1966 }
 0x2d0   :  { %1968 = vpow2.f32 %v695_v50 }
 0x2d3   :  { %1212 = vmatpush.bf16.msra.mxu2 %v1790_v57  ;;  %1225 = vmatpush.bf16.msra.mxu3 %v1794_v60  ;;  %v156_v57 = vadd.f32 %v2198_v5, %v2167_v36 }
 0x2d6   :  { %v1969_v53 = vpop.eup %1968 }
 0x2d7   :  { %1213 = vmatpush.bf16.msra.mxu2 %v1782_v0  ;;  %1226 = vmatpush.bf16.msra.mxu3 %v1786_v3 }
 0x2db   :  { %1214 = vmatpush.bf16.msra.mxu2 %v1774_v10  ;;  %1227 = vmatpush.bf16.msra.mxu3 %v1778_v13 }
 0x2df   :  { %1215 = vmatpush.bf16.msra.mxu2 %v1766_v22  ;;  %1228 = vmatpush.bf16.msra.mxu3 %v1770_v24 }
 0x336   :  { %v829_v25 = vpop.xlane.xlu2 %828 }
 0x337   :  { %v830_v35 = vsub.f32 %v2220_v32, %v829_v25 }
 0x339   :  { %v831_v39 = vmul.f32 1.442695, %v830_v35 }
 0x348   :  { %v945_v43 = vpop.f32.mrf.mxu2  ;;  %v958_v44 = vpop.f32.mrf.mxu3 }
 0x349   :  { %v962_v46 = vadd.f32 %v945_v43, %v122_v18  ;;  %v2233_v48 = vadd.f32 %v958_v44, %v151_v28 }
 0x34b   :  { %v975_v49 = vpack.c.bf16 %v962_v46, %v962_v46  ;;  %964 = vmax.xlane.f32.xlu2 %v2233_v48 }
 0x34d   :  { %1080 = vmatmul.bf16.vlgmr.msrb.gmra.mxu0 %v975_v49  ;;  %1093 = vmatmul.bf16.vlgmr.msrb.gmra.mxu1 %v975_v49 }
 0x350   :  { %v947_v51 = vpop.f32.mrf.mxu2  ;;  %v960_v52 = vpop.f32.mrf.mxu3 }
 0x353   :  { %289 = vadd.xlane.f32.xlu2 %v1967_v11 }
 0x35b   :  { %697 = vadd.xlane.f32.xlu2 %v1969_v53  ;;  %v558_v53 = vsub.f32 %v2206_v14, %v2223_v30 }
 0x35d   :  { %v559_v58 = vmul.f32 1.442695, %v558_v53 }
 0x3be   :  { %v965_v15 = vpop.xlane.xlu2 %964 }
 0x3bf   :  { %v966_v14 = vsub.f32 %v2233_v48, %v965_v15 }
 0x3c1   :  { %v967_v3 = vmul.f32 1.442695, %v966_v14 }
 0x3c6   :  { %v290_v27 = vpop.xlane.xlu2 %289 }
 0x3c7   :  { %1970 = vlog2.f32 %v290_v27 }
 0x3c8   :  { %1972 = vpow2.f32 %v423_v37 }
 0x3ca   :  { %v1081_v38 = vpop.f32.mrf.mxu0  ;;  %v1094_v40 = vpop.f32.mrf.mxu1 }
 0x3cb   :  { %v1098_v41 = vadd.f32 %v1081_v38, %v125_v34  ;;  %v1099_v17 = vadd.f32 %v1094_v40, %v154_v29 }
 0x3cd   :  { %v1971_v28 = vpop.eup %1970  ;;  %v1111_v42 = vpack.c.bf16 %v1098_v41, %v1098_v41  ;;  %1100 = vmax.xlane.f32.xlu0 %v1099_v17 }
 0x3ce   :  { %v292_v61 = vmul.f32 0.6931472, %v1971_v28  ;;  %v698_v18 = vpop.xlane.xlu2 %697  ;;  %v1973_v44 = vpop.eup %1972 }
 0x3cf   :  { %1974 = vlog2.f32 %v698_v18  ;;  %1216 = vmatmul.bf16.vlgmr.msra.gmra.mxu2 %v1111_v42  ;;  %1229 = vmatmul.bf16.vlgmr.msra.gmra.mxu3 %v1111_v42 }
 0x3d0   :  { %v293_v59 = vsub.f32 %v2226_v33, %v292_v61  ;;  %1976 = vpow2.f32 %v831_v39 }
 0x3d2   :  { %294 = vst [vmem:[#allocation5] sm:$0xff] %v293_v59  ;;  %v1083_v2 = vpop.f32.mrf.mxu0  ;;  %v1096_v43 = vpop.f32.mrf.mxu1 }
 0x3d5   :  { %v1975_v45 = vpop.eup %1974  ;;  %425 = vadd.xlane.f32.xlu0 %v1973_v44 }
 0x3d6   :  { %v700_v46 = vmul.f32 0.6931472, %v1975_v45  ;;  %v1977_v32 = vpop.eup %1976 }
 0x3d8   :  { %v701_v49 = vsub.f32 %v2237_v47, %v700_v46  ;;  %v127_v47 = vadd.f32 %v2200_v6, %v2157_v9 }
 0x3da   :  { %702 = vst [vmem:[#allocation5 + $0x18] sm:$0xff] %v701_v49 }
 0x3dd   :  { %833 = vadd.xlane.f32.xlu0 %v1977_v32 }
 0x440   :  { %v1101_v11 = vpop.xlane.xlu0 %1100 }
 0x441   :  { %v1102_v50 = vsub.f32 %v1099_v17, %v1101_v11 }
 0x443   :  { %v1103_v51 = vmul.f32 1.442695, %v1102_v50 }
 0x445   :  { %1978 = vpow2.f32 %v1103_v51 }
 0x448   :  { %v426_v52 = vpop.xlane.xlu0 %425 }
 0x449   :  { %1980 = vlog2.f32 %v426_v52 }
 0x44b   :  { %v1979_v33 = vpop.eup %1978 }
 0x44c   :  { %1105 = vadd.xlane.f32.xlu2 %v1979_v33 }
 0x44f   :  { %v1981_v54 = vpop.eup %1980 }
 0x450   :  { %v428_v55 = vmul.f32 0.6931472, %v1981_v54  ;;  %v834_v56 = vpop.xlane.xlu0 %833 }
 0x451   :  { %1982 = vlog2.f32 %v834_v56 }
 0x452   :  { %v429_v60 = vsub.f32 %v422_v16, %v428_v55  ;;  %v1217_v31 = vpop.f32.mrf.mxu2  ;;  %v1230_v62 = vpop.f32.mrf.mxu3  ;;  %1984 = vpow2.f32 %v559_v58 }
 0x453   :  { %v1234_v63 = vadd.f32 %v1217_v31, %v127_v47  ;;  %v1235_v0 = vadd.f32 %v1230_v62, %v156_v57  ;;  %1986 = vpow2.f32 %v967_v3 }
 0x454   :  { %430 = vst [vmem:[#allocation5 + $0x8] sm:$0xff] %v429_v60 }
 0x455   :  { %1247 = vst [vmem:[#allocation6] sm:$0xff] %v1234_v63  ;;  %1236 = vmax.xlane.f32.xlu1 %v1235_v0 }
 0x456   :  { %1271 = dma.vmem_to_hbm [thread:$0]  %s1267_s20, 128, %s1269_s23, [#allocation7]  }
 0x457   :  { %v1983_v30 = vpop.eup %1982 }
 0x458   :  { %v836_v1 = vmul.f32 0.6931472, %v1983_v30  ;;  %v1985_v36 = vpop.eup %1984 }
 0x459   :  { %v1987_v5 = vpop.eup %1986 }
 0x45a   :  { %v837_v9 = vsub.f32 %v830_v35, %v836_v1  ;;  %v1219_v6 = vpop.f32.mrf.mxu2  ;;  %v1232_v4 = vpop.f32.mrf.mxu3 }
 0x45c   :  { %838 = vst [vmem:[#allocation5 + $0x20] sm:$0xff] %v837_v9 }
 0x45d   :  { %561 = vadd.xlane.f32.xlu1 %v1985_v36 }
 0x465   :  { %969 = vadd.xlane.f32.xlu1 %v1987_v5 }
 0x4bf   :  { %v1106_v7 = vpop.xlane.xlu2 %1105 }
 0x4c0   :  { %1988 = vlog2.f32 %v1106_v7 }
 0x4c6   :  { %v1989_v8 = vpop.eup %1988 }
 0x4c7   :  { %v1108_v10 = vmul.f32 0.6931472, %v1989_v8 }
 0x4c8   :  { %v1237_v12 = vpop.xlane.xlu1 %1236 }
 0x4c9   :  { %v1109_v13 = vsub.f32 %v1102_v50, %v1108_v10  ;;  %v1238_v19 = vsub.f32 %v1235_v0, %v1237_v12 }
 0x4cb   :  { %1110 = vst [vmem:[#allocation5 + $0x30] sm:$0xff] %v1109_v13  ;;  %v1239_v48 = vmul.f32 1.442695, %v1238_v19 }
 0x4cd   :  { %1990 = vpow2.f32 %v1239_v48 }
 0x4d0   :  { %v562_v20 = vpop.xlane.xlu1 %561 }
 0x4d1   :  { %1992 = vlog2.f32 %v562_v20 }
 0x4d3   :  { %v1991_v21 = vpop.eup %1990 }
 0x4d4   :  { %1241 = vadd.xlane.f32.xlu0 %v1991_v21 }
 0x4d7   :  { %v1993_v22 = vpop.eup %1992 }
 0x4d8   :  { %v564_v23 = vmul.f32 0.6931472, %v1993_v22  ;;  %v970_v24 = vpop.xlane.xlu1 %969 }
 0x4d9   :  { %1994 = vlog2.f32 %v970_v24 }
 0x4da   :  { %v565_v25 = vsub.f32 %v558_v53, %v564_v23 }
 0x4dc   :  { %566 = vst [vmem:[#allocation5 + $0x10] sm:$0xff] %v565_v25 }
 0x4df   :  { %v1995_v15 = vpop.eup %1994 }
 0x4e0   :  { %v972_v26 = vmul.f32 0.6931472, %v1995_v15 }
 0x4e2   :  { %v973_v16 = vsub.f32 %v966_v14, %v972_v26 }
 0x4e4   :  { %974 = vst [vmem:[#allocation5 + $0x28] sm:$0xff] %v973_v16 }
 0x547   :  { %v1242_v27 = vpop.xlane.xlu0 %1241 }
 0x548   :  { %1996 = vlog2.f32 %v1242_v27 }
 0x54e   :  { %v1997_v29 = vpop.eup %1996 }
 0x54f   :  { %v1244_v34 = vmul.f32 0.6931472, %v1997_v29 }
 0x551   :  { %v1245_v37 = vsub.f32 %v1238_v19, %v1244_v34 }
 0x553   :  { %1246 = vst [vmem:[#allocation5 + $0x38] sm:$0xff] %v1245_v37 }
 0x554   :  { %1260 = dma.vmem_to_hbm [thread:$0]  %s1253_s25, 1024, %s1255_s28, [#allocation4], %s2077_s26, %s2077_s26, %s2078_s27  }
 0x555   :  { %2072 = dma.done.wait [#allocation4], 1024  }
 0x556   :  { %2073 = vsyncadd [#allocation4], 4294966272 }
 0x557   :  { %2074 = dma.done.wait [#allocation7], 128  }
 0x558   :  { %2075 = vsyncadd [#allocation7], 4294967168 }
 0x559   :  { %1280 = vsyncpa [#allocation3], 1 }
 0x55a   :  { %1281 = vsyncpa [#allocation4], 1 }
 0x55b   :  { %1282 = vsyncpa [#allocation7], 1 }

</bundles_post_ra>
